<compile_context>
chip_gen: v5e
topology: v5e:2x2
jax: 0.10.0
libtpu: 0.0.40
codegen_flags: <defaults>
</compile_context>

<pallas_src>
import functools

import jax
import jax.numpy as jnp
from jax import lax
from jax.experimental import pallas as pl
from jax.experimental.pallas import tpu as pltpu


# ---------------------------------------------------------------------------
# wrapper-side helpers (static tables, BN folding, bf16-exact weight splits)
# ---------------------------------------------------------------------------
def _fold_bn(gamma, beta, mean, var, eps=1e-5):
    """Inference-mode BN as per-channel (scale, bias)."""
    scale = gamma / jnp.sqrt(var + eps)
    return scale, beta - mean * scale


def _split_bf16(a):
    """Split f32 into (hi, lo): hi is exactly bf16-representable, lo is tiny.
    Keeps MXU matmuls ~f32-accurate even on the default 1-pass bf16 path."""
    hi = a.astype(jnp.bfloat16).astype(jnp.float32)
    return hi, a - hi


def _border_masks(H, W, offsets):
    """(ntaps, H*W) 0/1 f32 masks: mask[k, p] = 1 iff pixel p displaced by
    offsets[k] = (dy, dx) stays inside the HxW image.  Kills the wrap-around
    pixels introduced by the flat-index rolls in the depthwise convs."""
    p = jnp.arange(H * W)
    row, col = p // W, p % W
    rows = []
    for dy, dx in offsets:
        ok = ((row + dy >= 0) & (row + dy < H) &
              (col + dx >= 0) & (col + dx < W))
        rows.append(ok.astype(jnp.float32))
    return jnp.stack(rows, 0)


def _pool_upsample_mats(H, W):
    """Flat-index selection matrices: S (HW, HhWh) with 0.25 entries does the
    2x2 average pool; U (HhWh, HW) with 0/1 entries does the nearest 2x
    upsample.  Both are exactly bf16-representable."""
    Hh, Wh = H // 2, W // 2
    h, w = jnp.arange(H), jnp.arange(W)
    full_to_half = ((h[:, None] // 2) * Wh + (w[None, :] // 2)).reshape(-1)   # (HW,)
    q = jnp.arange(Hh * Wh)
    S = 0.25 * (full_to_half[:, None] == q[None, :]).astype(jnp.float32)      # (HW, HhWh)
    U = (q[:, None] == full_to_half[None, :]).astype(jnp.float32)             # (HhWh, HW)
    return S, U


# ---------------------------------------------------------------------------
# in-kernel building blocks
# ---------------------------------------------------------------------------
def _split(x):
    hi = x.astype(jnp.bfloat16).astype(jnp.float32)
    return hi, x - hi


def _dot_split(w_hi, w_lo, x_hi, x_lo):
    """(w_hi + w_lo) @ (x_hi + x_lo) with the ~2^-18 lo@lo term dropped.
    Every operand is (nearly) exactly bf16, so the MXU bf16 fast path gives
    ~f32 accuracy; consecutive dots target the same accumulator (MRB-friendly
    on v7x)."""
    acc = jnp.dot(w_hi, x_hi, preferred_element_type=jnp.float32)
    acc = acc + jnp.dot(w_hi, x_lo, preferred_element_type=jnp.float32)
    acc = acc + jnp.dot(w_lo, x_hi, preferred_element_type=jnp.float32)
    return acc


def _depthwise_flat(y, w_cols, masks, shifts):
    """Depthwise conv on lane-dense flattened spatial data (all channels at
    once).
      y:      (C, L)      activations, L = H*W on the lane axis
      w_cols: (C, ntaps)  per-channel tap weights (BN scale folded in)
      masks:  (ntaps, L)  0/1 border masks (precomputed in the wrapper)
      shifts: static flat-index offsets; tap k reads y[:, p + shifts[k]]
    Shifts run on the XLU (pltpu.roll), masks/MACs on the VPU; no padded VMEM
    scratch, no halo re-zeroing, no unaligned loads."""
    L = y.shape[-1]
    acc = None
    for k, d in enumerate(shifts):
        t = y if d == 0 else pltpu.roll(y, shift=(-d) % L, axis=1)
        t = t * masks[k:k + 1, :] * w_cols[:, k:k + 1]
        acc = t if acc is None else acc + t
    return acc


# ---------------------------------------------------------------------------
# fused kernels (grid over batch, "parallel")
# ---------------------------------------------------------------------------
def _ghost_attn_kernel(shifts3, shiftsw, shiftsh,
                       x_ref, S_ref, U_ref, m3_ref, mw_ref, mh_ref,
                       wp_hi_ref, wp_lo_ref, bp_ref, wdw_ref, bc_ref,
                       w1_hi_ref, w1_lo_ref, b1_ref, wh_ref, b2_ref,
                       wv_ref, b3_ref, o_ref):
    C1 = bp_ref.shape[0]
    OC = o_ref.shape[1]

    x = x_ref[0]                                   # (Cin, HW): single HBM read of x
    x_hi, x_lo = _split(x)

    # ---------------- DFC attention gate ("short_conv") ----------------
    # 2x2 avg-pool of ALL channels in one pair of MXU matmuls.
    S = S_ref[...]
    xp = jnp.dot(x_hi, S, preferred_element_type=jnp.float32)
    xp = xp + jnp.dot(x_lo, S, preferred_element_type=jnp.float32)        # (Cin, HhWh)

    # 1x1 conv (+folded BN) on the MXU: (OC, Cin) @ (Cin, HhWh)
    xp_hi, xp_lo = _split(xp)
    r = _dot_split(w1_hi_ref[...], w1_lo_ref[...], xp_hi, xp_lo) + b1_ref[...]

    # depthwise (1,5) then (5,1), SAME padding, at half resolution
    r = _depthwise_flat(r, wh_ref[...], mw_ref[...], shiftsw) + b2_ref[...]
    r = _depthwise_flat(r, wv_ref[...], mh_ref[...], shiftsh) + b3_ref[...]
    g = jax.nn.sigmoid(r)                                                  # (OC, HhWh)

    # nearest 2x upsample of ALL gates in one pair of matmuls; the
    # full-resolution gate never touches HBM.
    g_hi, g_lo = _split(g)
    U = U_ref[...]
    gate = jnp.dot(g_hi, U, preferred_element_type=jnp.float32)
    gate = gate + jnp.dot(g_lo, U, preferred_element_type=jnp.float32)     # (OC, HW)

    # ---------------- main (ghost) branch ----------------
    # primary 1x1 conv (+BN, ReLU) on the MXU; gate + store immediately so the
    # live set stays small.
    x1 = jnp.maximum(
        _dot_split(wp_hi_ref[...], wp_lo_ref[...], x_hi, x_lo) + bp_ref[...], 0.0)
    o_ref[0, 0:C1, :] = x1 * gate[0:C1, :]

    # cheap depthwise dw x dw conv (+BN, ReLU), all channels at once.
    x2 = jnp.maximum(
        _depthwise_flat(x1, wdw_ref[...], m3_ref[...], shifts3) + bc_ref[...], 0.0)
    o_ref[0, C1:OC, :] = x2[0:OC - C1, :] * gate[C1:OC, :]


def _ghost_orig_kernel(shifts3, x_ref, m3_ref, wp_hi_ref, wp_lo_ref,
                       bp_ref, wdw_ref, bc_ref, o_ref):
    C1 = bp_ref.shape[0]
    OC = o_ref.shape[1]
    x = x_ref[0]
    x_hi, x_lo = _split(x)
    x1 = jnp.maximum(
        _dot_split(wp_hi_ref[...], wp_lo_ref[...], x_hi, x_lo) + bp_ref[...], 0.0)
    o_ref[0, 0:C1, :] = x1
    x2 = jnp.maximum(
        _depthwise_flat(x1, wdw_ref[...], m3_ref[...], shifts3) + bc_ref[...], 0.0)
    o_ref[0, C1:OC, :] = x2[0:OC - C1, :]


# ---------------------------------------------------------------------------
# wrapper
# ---------------------------------------------------------------------------
def ghost_module_v2(x_nchw, params, mode="attn"):
    x = x_nchw.astype(jnp.float32)
    B, Cin, H, W = x.shape
    HW = H * W
    OC = params["out_channels"]
    dw = params["wdw"].shape[0]
    p = dw // 2

    # Fold inference-mode BN into conv weights (scale) + bias; transpose the
    # 1x1 weights to (Cout, Cin) for MXU `w @ x`; split to bf16-exact hi/lo.
    sp, bp = _fold_bn(*params["bn_p"])
    wp_t = (params["wp"][0, 0] * sp[None, :]).T                           # (C1, Cin)
    C1 = wp_t.shape[0]
    wp_hi, wp_lo = _split_bf16(wp_t)
    sc, bc = _fold_bn(*params["bn_c"])
    wdw_cols = (params["wdw"][:, :, 0, :] * sc[None, None, :]
                ).reshape(dw * dw, C1).T                                  # (C1, dw*dw)
    bp_c = bp.reshape(C1, 1)
    bc_c = bc.reshape(C1, 1)

    # Static tables: border masks for the flat-index depthwise taps.
    offs3 = [(ky - p, kx - p) for ky in range(dw) for kx in range(dw)]
    shifts3 = tuple(dy * W + dx for dy, dx in offs3)
    mask3 = _border_masks(H, W, offs3)

    # Lane-dense layout: fold H*W onto the lane axis (free reshape in HBM).
    x_flat = x.reshape(B, Cin, HW)

    full = lambda a: pl.BlockSpec(a.shape, lambda b: (0,) * a.ndim)
    x_spec = pl.BlockSpec((1, Cin, HW), lambda b: (b, 0, 0))
    o_spec = pl.BlockSpec((1, OC, HW), lambda b: (b, 0, 0))
    cparams = pltpu.CompilerParams(
        dimension_semantics=("parallel",),      # megacore split over batch
        vmem_limit_bytes=32 * 1024 * 1024)      # far above need; < v7x's 64 MiB

    if mode == "attn":
        assert H % 2 == 0 and W % 2 == 0, "attn mode assumes even H, W"
        Hh, Wh = H // 2, W // 2
        s1, b1 = _fold_bn(*params["bn1"])
        w1_t = (params["w1"][0, 0] * s1[None, :]).T                       # (OC, Cin)
        w1_hi, w1_lo = _split_bf16(w1_t)
        s2, b2 = _fold_bn(*params["bn2"])
        wh_cols = (params["wh"][0, :, 0, :] * s2[None, :]).T              # (OC, 5)
        s3, b3 = _fold_bn(*params["bn3"])
        wv_cols = (params["wv"][:, 0, 0, :] * s3[None, :]).T              # (OC, 5)
        b1_c = b1.reshape(OC, 1)
        b2_c = b2.reshape(OC, 1)
        b3_c = b3.reshape(OC, 1)

        offsw = [(0, dx - 2) for dx in range(5)]
        shiftsw = tuple(dx for _, dx in offsw)
        maskw = _border_masks(Hh, Wh, offsw)
        offsh = [(dy - 2, 0) for dy in range(5)]
        shiftsh = tuple(dy * Wh for dy, _ in offsh)
        maskh = _border_masks(Hh, Wh, offsh)

        S, U = _pool_upsample_mats(H, W)

        out = pl.pallas_call(
            functools.partial(_ghost_attn_kernel, shifts3, shiftsw, shiftsh),
            out_shape=jax.ShapeDtypeStruct((B, OC, HW), jnp.float32),
            grid=(B,),
            in_specs=[x_spec, full(S), full(U),
                      full(mask3), full(maskw), full(maskh),
                      full(wp_hi), full(wp_lo), full(bp_c),
                      full(wdw_cols), full(bc_c),
                      full(w1_hi), full(w1_lo), full(b1_c),
                      full(wh_cols), full(b2_c), full(wv_cols), full(b3_c)],
            out_specs=o_spec,
            compiler_params=cparams,
        )(x_flat, S, U, mask3, maskw, maskh,
          wp_hi, wp_lo, bp_c, wdw_cols, bc_c,
          w1_hi, w1_lo, b1_c, wh_cols, b2_c, wv_cols, b3_c)
    else:  # "original": specialized gate-free kernel
        out = pl.pallas_call(
            functools.partial(_ghost_orig_kernel, shifts3),
            out_shape=jax.ShapeDtypeStruct((B, OC, HW), jnp.float32),
            grid=(B,),
            in_specs=[x_spec, full(mask3),
                      full(wp_hi), full(wp_lo), full(bp_c),
                      full(wdw_cols), full(bc_c)],
            out_specs=o_spec,
            compiler_params=cparams,
        )(x_flat, mask3, wp_hi, wp_lo, bp_c, wdw_cols, bc_c)

    return out.reshape(B, OC, H, W)


# ---------------------------------------------------------------------------
# deterministic parameter construction (shapes from GhostModuleV2.__init__)
# ---------------------------------------------------------------------------
def init_params(key, in_channels, out_channels, ratio=2, dw_size=3):
    C1 = -(-out_channels // ratio)          # init_channels = ceil(OC / ratio)
    new = C1 * (ratio - 1)                  # new_channels
    assert new == C1, "cheap_operation implemented as 1:1 depthwise (ratio=2)"
    ks = jax.random.split(key, 10)

    def w(k, shape, scale=0.3):
        return scale * jax.random.normal(k, shape, jnp.float32)

    def bn(k, c):
        k1, k2, k3, k4 = jax.random.split(k, 4)
        return (1.0 + 0.1 * jax.random.normal(k1, (c,), jnp.float32),
                0.1 * jax.random.normal(k2, (c,), jnp.float32),
                0.1 * jax.random.normal(k3, (c,), jnp.float32),
                1.0 + 0.1 * jax.random.uniform(k4, (c,), jnp.float32))

    return dict(
        out_channels=out_channels,
        wp=w(ks[0], (1, 1, in_channels, C1)),            # primary 1x1 conv (HWIO)
        bn_p=bn(ks[1], C1),
        wdw=w(ks[2], (dw_size, dw_size, 1, new)),        # cheap dw conv (HWIO)
        bn_c=bn(ks[3], new),
        w1=w(ks[4], (1, 1, in_channels, out_channels)),  # short_conv 1x1
        bn1=bn(ks[5], out_channels),
        wh=w(ks[6], (1, 5, 1, out_channels)),            # short_conv dw (1,5)
        bn2=bn(ks[7], out_channels),
        wv=w(ks[8], (5, 1, 1, out_channels)),            # short_conv dw (5,1)
        bn3=bn(ks[9], out_channels),
    )


# ---------------------------------------------------------------------------
# pure-JAX reference (same math, lax convs) for validation
# ---------------------------------------------------------------------------
def ref_forward(x_nchw, p, mode="attn"):
    x = jnp.transpose(x_nchw, (0, 2, 3, 1)).astype(jnp.float32)
    OC = p["out_channels"]
    C1 = p["wp"].shape[-1]
    pd = p["wdw"].shape[0] // 2

    def conv(y, w, pad, groups=1):
        return lax.conv_general_dilated(
            y, w, (1, 1), pad, dimension_numbers=("NHWC", "HWIO", "NHWC"),
            feature_group_count=groups, precision=lax.Precision.HIGHEST)

    def bn(y, g, b, m, v):
        return (y - m) / jnp.sqrt(v + 1e-5) * g + b

    x1 = jax.nn.relu(bn(conv(x, p["wp"], ((0, 0), (0, 0))), *p["bn_p"]))
    x2 = jax.nn.relu(bn(conv(x1, p["wdw"], ((pd, pd), (pd, pd)), groups=C1),
                        *p["bn_c"]))
    out = jnp.concatenate([x1, x2], -1)[..., :OC]
    if mode == "attn":
        xp = lax.reduce_window(x, jnp.array(0., jnp.float32), lax.add,
                               (1, 2, 2, 1), (1, 2, 2, 1), "VALID") / 4.0
        r = bn(conv(xp, p["w1"], ((0, 0), (0, 0))), *p["bn1"])
        r = bn(conv(r, p["wh"], ((0, 0), (2, 2)), groups=OC), *p["bn2"])
        r = bn(conv(r, p["wv"], ((2, 2), (0, 0)), groups=OC), *p["bn3"])
        g = jax.nn.sigmoid(r)
        g = jnp.repeat(jnp.repeat(g, 2, axis=1), 2, axis=2)
        out = out * g
    return jnp.transpose(out, (0, 3, 1, 2))


if __name__ == "__main__":
    key = jax.random.PRNGKey(0)
    kx, kp = jax.random.split(key)
    B, Cin, H, W = 2, 4, 16, 16
    OC = 8

    x = jax.random.normal(kx, (B, Cin, H, W), jnp.float32)
    params = init_params(kp, Cin, OC)

    out_attn = jax.block_until_ready(ghost_module_v2(x, params, mode="attn"))
    out_orig = jax.block_until_ready(ghost_module_v2(x, params, mode="original"))

    ref_attn = ref_forward(x, params, "attn")
    ref_orig = ref_forward(x, params, "original")

    assert out_attn.shape == (B, OC, H, W) and out_orig.shape == (B, OC, H, W)
    # tolerance leaves margin for MXU bf16-split rounding / EUP transcendentals
    assert jnp.allclose(out_attn, ref_attn, atol=2e-3, rtol=2e-3), \
        float(jnp.max(jnp.abs(out_attn - ref_attn)))
    assert jnp.allclose(out_orig, ref_orig, atol=2e-3, rtol=2e-3), \
        float(jnp.max(jnp.abs(out_orig - ref_orig)))
    print("KERNEL_OK")
</pallas_src>

<mosaic_0001>
module attributes {stable_mosaic.version = 11 : i64} {
  func.func @_ghost_attn_kernel(%arg0: i32, %arg1: memref<1x4x256xf32, #tpu.memory_space<vmem>>, %arg2: memref<256x64xf32, #tpu.memory_space<vmem>>, %arg3: memref<64x256xf32, #tpu.memory_space<vmem>>, %arg4: memref<9x256xf32, #tpu.memory_space<vmem>>, %arg5: memref<5x64xf32, #tpu.memory_space<vmem>>, %arg6: memref<5x64xf32, #tpu.memory_space<vmem>>, %arg7: memref<4x4xf32, #tpu.memory_space<vmem>>, %arg8: memref<4x4xf32, #tpu.memory_space<vmem>>, %arg9: memref<4x1xf32, #tpu.memory_space<vmem>>, %arg10: memref<4x9xf32, #tpu.memory_space<vmem>>, %arg11: memref<4x1xf32, #tpu.memory_space<vmem>>, %arg12: memref<8x4xf32, #tpu.memory_space<vmem>>, %arg13: memref<8x4xf32, #tpu.memory_space<vmem>>, %arg14: memref<8x1xf32, #tpu.memory_space<vmem>>, %arg15: memref<8x5xf32, #tpu.memory_space<vmem>>, %arg16: memref<8x1xf32, #tpu.memory_space<vmem>>, %arg17: memref<8x5xf32, #tpu.memory_space<vmem>>, %arg18: memref<8x1xf32, #tpu.memory_space<vmem>>, %arg19: memref<1x8x256xf32, #tpu.memory_space<vmem>>) attributes {dimension_semantics = [#tpu.dimension_semantics<parallel>], iteration_bounds = array<i64: 2>, scalar_prefetch = 0 : i64, scratch_operands = 0 : i64, tpu.core_type = #tpu.core_type<tc>, window_params = [{transform_indices = @transform_0, window_bounds = array<i64: 1, 4, 256>}, {pipeline_mode = #tpu.pipeline_mode<synchronous>, transform_indices = @transform_1, window_bounds = array<i64: 256, 64>}, {pipeline_mode = #tpu.pipeline_mode<synchronous>, transform_indices = @transform_2, window_bounds = array<i64: 64, 256>}, {pipeline_mode = #tpu.pipeline_mode<synchronous>, transform_indices = @transform_3, window_bounds = array<i64: 9, 256>}, {pipeline_mode = #tpu.pipeline_mode<synchronous>, transform_indices = @transform_4, window_bounds = array<i64: 5, 64>}, {pipeline_mode = #tpu.pipeline_mode<synchronous>, transform_indices = @transform_5, window_bounds = array<i64: 5, 64>}, {pipeline_mode = #tpu.pipeline_mode<synchronous>, transform_indices = @transform_6, window_bounds = array<i64: 4, 4>}, {pipeline_mode = #tpu.pipeline_mode<synchronous>, transform_indices = @transform_7, window_bounds = array<i64: 4, 4>}, {pipeline_mode = #tpu.pipeline_mode<synchronous>, transform_indices = @transform_8, window_bounds = array<i64: 4, 1>}, {pipeline_mode = #tpu.pipeline_mode<synchronous>, transform_indices = @transform_9, window_bounds = array<i64: 4, 9>}, {pipeline_mode = #tpu.pipeline_mode<synchronous>, transform_indices = @transform_10, window_bounds = array<i64: 4, 1>}, {pipeline_mode = #tpu.pipeline_mode<synchronous>, transform_indices = @transform_11, window_bounds = array<i64: 8, 4>}, {pipeline_mode = #tpu.pipeline_mode<synchronous>, transform_indices = @transform_12, window_bounds = array<i64: 8, 4>}, {pipeline_mode = #tpu.pipeline_mode<synchronous>, transform_indices = @transform_13, window_bounds = array<i64: 8, 1>}, {pipeline_mode = #tpu.pipeline_mode<synchronous>, transform_indices = @transform_14, window_bounds = array<i64: 8, 5>}, {pipeline_mode = #tpu.pipeline_mode<synchronous>, transform_indices = @transform_15, window_bounds = array<i64: 8, 1>}, {pipeline_mode = #tpu.pipeline_mode<synchronous>, transform_indices = @transform_16, window_bounds = array<i64: 8, 5>}, {pipeline_mode = #tpu.pipeline_mode<synchronous>, transform_indices = @transform_17, window_bounds = array<i64: 8, 1>}, {transform_indices = @transform_18, window_bounds = array<i64: 1, 8, 256>}]} {
    %c0 = arith.constant 0 : index
    %c0_0 = arith.constant 0 : index
    %c0_1 = arith.constant 0 : index
    %0 = vector.load %arg1[%c0, %c0_0, %c0_1] : memref<1x4x256xf32, #tpu.memory_space<vmem>>, vector<1x4x256xf32>
    %1 = vector.shape_cast %0 : vector<1x4x256xf32> to vector<4x256xf32>
    %2 = arith.truncf %1 : vector<4x256xf32> to vector<4x256xbf16>
    %3 = arith.extf %2 : vector<4x256xbf16> to vector<4x256xf32>
    %4 = arith.subf %1, %3 : vector<4x256xf32>
    %c0_2 = arith.constant 0 : index
    %c0_3 = arith.constant 0 : index
    %5 = vector.load %arg2[%c0_2, %c0_3] : memref<256x64xf32, #tpu.memory_space<vmem>>, vector<256x64xf32>
    %cst = arith.constant dense<0.000000e+00> : vector<4x64xf32>
    %6 = tpu.matmul %3, %5, %cst {dimension_numbers = #tpu.dot_dimension_numbers<[1], [0], [0], [1], [0, 0, 1, 1], [], []>} : vector<4x256xf32>, vector<256x64xf32>, vector<4x64xf32> -> vector<4x64xf32>
    %cst_4 = arith.constant dense<0.000000e+00> : vector<4x64xf32>
    %7 = tpu.matmul %4, %5, %cst_4 {dimension_numbers = #tpu.dot_dimension_numbers<[1], [0], [0], [1], [0, 0, 1, 1], [], []>} : vector<4x256xf32>, vector<256x64xf32>, vector<4x64xf32> -> vector<4x64xf32>
    %8 = arith.addf %6, %7 : vector<4x64xf32>
    %9 = arith.truncf %8 : vector<4x64xf32> to vector<4x64xbf16>
    %10 = arith.extf %9 : vector<4x64xbf16> to vector<4x64xf32>
    %11 = arith.subf %8, %10 : vector<4x64xf32>
    %c0_5 = arith.constant 0 : index
    %c0_6 = arith.constant 0 : index
    %12 = vector.load %arg12[%c0_5, %c0_6] : memref<8x4xf32, #tpu.memory_space<vmem>>, vector<8x4xf32>
    %c0_7 = arith.constant 0 : index
    %c0_8 = arith.constant 0 : index
    %13 = vector.load %arg13[%c0_7, %c0_8] : memref<8x4xf32, #tpu.memory_space<vmem>>, vector<8x4xf32>
    %cst_9 = arith.constant dense<0.000000e+00> : vector<8x64xf32>
    %14 = tpu.matmul %12, %10, %cst_9 {dimension_numbers = #tpu.dot_dimension_numbers<[1], [0], [0], [1], [0, 0, 1, 1], [], []>} : vector<8x4xf32>, vector<4x64xf32>, vector<8x64xf32> -> vector<8x64xf32>
    %cst_10 = arith.constant dense<0.000000e+00> : vector<8x64xf32>
    %15 = tpu.matmul %12, %11, %cst_10 {dimension_numbers = #tpu.dot_dimension_numbers<[1], [0], [0], [1], [0, 0, 1, 1], [], []>} : vector<8x4xf32>, vector<4x64xf32>, vector<8x64xf32> -> vector<8x64xf32>
    %16 = arith.addf %14, %15 : vector<8x64xf32>
    %cst_11 = arith.constant dense<0.000000e+00> : vector<8x64xf32>
    %17 = tpu.matmul %13, %10, %cst_11 {dimension_numbers = #tpu.dot_dimension_numbers<[1], [0], [0], [1], [0, 0, 1, 1], [], []>} : vector<8x4xf32>, vector<4x64xf32>, vector<8x64xf32> -> vector<8x64xf32>
    %18 = arith.addf %16, %17 : vector<8x64xf32>
    %c0_12 = arith.constant 0 : index
    %c0_13 = arith.constant 0 : index
    %19 = vector.load %arg14[%c0_12, %c0_13] : memref<8x1xf32, #tpu.memory_space<vmem>>, vector<8x1xf32>
    %20 = vector.broadcast %19 : vector<8x1xf32> to vector<8x64xf32>
    %21 = arith.addf %18, %20 : vector<8x64xf32>
    %c0_14 = arith.constant 0 : index
    %c0_15 = arith.constant 0 : index
    %22 = vector.load %arg15[%c0_14, %c0_15] : memref<8x5xf32, #tpu.memory_space<vmem>>, vector<8x5xf32>
    %c0_16 = arith.constant 0 : index
    %c0_17 = arith.constant 0 : index
    %23 = vector.load %arg5[%c0_16, %c0_17] : memref<5x64xf32, #tpu.memory_space<vmem>>, vector<5x64xf32>
    %c2_i32 = arith.constant 2 : i32
    %24 = tpu.dynamic_rotate %21 by %c2_i32 dim 1 : vector<8x64xf32>, i32 -> vector<8x64xf32>
    %25 = vector.extract_strided_slice %23 {offsets = [0, 0], sizes = [1, 64], strides = [1, 1]} : vector<5x64xf32> to vector<1x64xf32>
    %26 = vector.broadcast %25 : vector<1x64xf32> to vector<8x64xf32>
    %27 = arith.mulf %24, %26 : vector<8x64xf32>
    %28 = vector.extract_strided_slice %22 {offsets = [0, 0], sizes = [8, 1], strides = [1, 1]} : vector<8x5xf32> to vector<8x1xf32>
    %29 = vector.broadcast %28 : vector<8x1xf32> to vector<8x64xf32>
    %30 = arith.mulf %27, %29 : vector<8x64xf32>
    %c1_i32 = arith.constant 1 : i32
    %31 = tpu.dynamic_rotate %21 by %c1_i32 dim 1 : vector<8x64xf32>, i32 -> vector<8x64xf32>
    %32 = vector.extract_strided_slice %23 {offsets = [1, 0], sizes = [1, 64], strides = [1, 1]} : vector<5x64xf32> to vector<1x64xf32>
    %33 = vector.broadcast %32 : vector<1x64xf32> to vector<8x64xf32>
    %34 = arith.mulf %31, %33 : vector<8x64xf32>
    %35 = vector.extract_strided_slice %22 {offsets = [0, 1], sizes = [8, 1], strides = [1, 1]} : vector<8x5xf32> to vector<8x1xf32>
    %36 = vector.broadcast %35 : vector<8x1xf32> to vector<8x64xf32>
    %37 = arith.mulf %34, %36 : vector<8x64xf32>
    %38 = arith.addf %30, %37 : vector<8x64xf32>
    %39 = vector.extract_strided_slice %23 {offsets = [2, 0], sizes = [1, 64], strides = [1, 1]} : vector<5x64xf32> to vector<1x64xf32>
    %40 = vector.broadcast %39 : vector<1x64xf32> to vector<8x64xf32>
    %41 = arith.mulf %21, %40 : vector<8x64xf32>
    %42 = vector.extract_strided_slice %22 {offsets = [0, 2], sizes = [8, 1], strides = [1, 1]} : vector<8x5xf32> to vector<8x1xf32>
    %43 = vector.broadcast %42 : vector<8x1xf32> to vector<8x64xf32>
    %44 = arith.mulf %41, %43 : vector<8x64xf32>
    %45 = arith.addf %38, %44 : vector<8x64xf32>
    %c63_i32 = arith.constant 63 : i32
    %46 = tpu.dynamic_rotate %21 by %c63_i32 dim 1 : vector<8x64xf32>, i32 -> vector<8x64xf32>
    %47 = vector.extract_strided_slice %23 {offsets = [3, 0], sizes = [1, 64], strides = [1, 1]} : vector<5x64xf32> to vector<1x64xf32>
    %48 = vector.broadcast %47 : vector<1x64xf32> to vector<8x64xf32>
    %49 = arith.mulf %46, %48 : vector<8x64xf32>
    %50 = vector.extract_strided_slice %22 {offsets = [0, 3], sizes = [8, 1], strides = [1, 1]} : vector<8x5xf32> to vector<8x1xf32>
    %51 = vector.broadcast %50 : vector<8x1xf32> to vector<8x64xf32>
    %52 = arith.mulf %49, %51 : vector<8x64xf32>
    %53 = arith.addf %45, %52 : vector<8x64xf32>
    %c62_i32 = arith.constant 62 : i32
    %54 = tpu.dynamic_rotate %21 by %c62_i32 dim 1 : vector<8x64xf32>, i32 -> vector<8x64xf32>
    %55 = vector.extract_strided_slice %23 {offsets = [4, 0], sizes = [1, 64], strides = [1, 1]} : vector<5x64xf32> to vector<1x64xf32>
    %56 = vector.broadcast %55 : vector<1x64xf32> to vector<8x64xf32>
    %57 = arith.mulf %54, %56 : vector<8x64xf32>
    %58 = vector.extract_strided_slice %22 {offsets = [0, 4], sizes = [8, 1], strides = [1, 1]} : vector<8x5xf32> to vector<8x1xf32>
    %59 = vector.broadcast %58 : vector<8x1xf32> to vector<8x64xf32>
    %60 = arith.mulf %57, %59 : vector<8x64xf32>
    %61 = arith.addf %53, %60 : vector<8x64xf32>
    %c0_18 = arith.constant 0 : index
    %c0_19 = arith.constant 0 : index
    %62 = vector.load %arg16[%c0_18, %c0_19] : memref<8x1xf32, #tpu.memory_space<vmem>>, vector<8x1xf32>
    %63 = vector.broadcast %62 : vector<8x1xf32> to vector<8x64xf32>
    %64 = arith.addf %61, %63 : vector<8x64xf32>
    %c0_20 = arith.constant 0 : index
    %c0_21 = arith.constant 0 : index
    %65 = vector.load %arg17[%c0_20, %c0_21] : memref<8x5xf32, #tpu.memory_space<vmem>>, vector<8x5xf32>
    %c0_22 = arith.constant 0 : index
    %c0_23 = arith.constant 0 : index
    %66 = vector.load %arg6[%c0_22, %c0_23] : memref<5x64xf32, #tpu.memory_space<vmem>>, vector<5x64xf32>
    %c16_i32 = arith.constant 16 : i32
    %67 = tpu.dynamic_rotate %64 by %c16_i32 dim 1 : vector<8x64xf32>, i32 -> vector<8x64xf32>
    %68 = vector.extract_strided_slice %66 {offsets = [0, 0], sizes = [1, 64], strides = [1, 1]} : vector<5x64xf32> to vector<1x64xf32>
    %69 = vector.broadcast %68 : vector<1x64xf32> to vector<8x64xf32>
    %70 = arith.mulf %67, %69 : vector<8x64xf32>
    %71 = vector.extract_strided_slice %65 {offsets = [0, 0], sizes = [8, 1], strides = [1, 1]} : vector<8x5xf32> to vector<8x1xf32>
    %72 = vector.broadcast %71 : vector<8x1xf32> to vector<8x64xf32>
    %73 = arith.mulf %70, %72 : vector<8x64xf32>
    %c8_i32 = arith.constant 8 : i32
    %74 = tpu.dynamic_rotate %64 by %c8_i32 dim 1 : vector<8x64xf32>, i32 -> vector<8x64xf32>
    %75 = vector.extract_strided_slice %66 {offsets = [1, 0], sizes = [1, 64], strides = [1, 1]} : vector<5x64xf32> to vector<1x64xf32>
    %76 = vector.broadcast %75 : vector<1x64xf32> to vector<8x64xf32>
    %77 = arith.mulf %74, %76 : vector<8x64xf32>
    %78 = vector.extract_strided_slice %65 {offsets = [0, 1], sizes = [8, 1], strides = [1, 1]} : vector<8x5xf32> to vector<8x1xf32>
    %79 = vector.broadcast %78 : vector<8x1xf32> to vector<8x64xf32>
    %80 = arith.mulf %77, %79 : vector<8x64xf32>
    %81 = arith.addf %73, %80 : vector<8x64xf32>
    %82 = vector.extract_strided_slice %66 {offsets = [2, 0], sizes = [1, 64], strides = [1, 1]} : vector<5x64xf32> to vector<1x64xf32>
    %83 = vector.broadcast %82 : vector<1x64xf32> to vector<8x64xf32>
    %84 = arith.mulf %64, %83 : vector<8x64xf32>
    %85 = vector.extract_strided_slice %65 {offsets = [0, 2], sizes = [8, 1], strides = [1, 1]} : vector<8x5xf32> to vector<8x1xf32>
    %86 = vector.broadcast %85 : vector<8x1xf32> to vector<8x64xf32>
    %87 = arith.mulf %84, %86 : vector<8x64xf32>
    %88 = arith.addf %81, %87 : vector<8x64xf32>
    %c56_i32 = arith.constant 56 : i32
    %89 = tpu.dynamic_rotate %64 by %c56_i32 dim 1 : vector<8x64xf32>, i32 -> vector<8x64xf32>
    %90 = vector.extract_strided_slice %66 {offsets = [3, 0], sizes = [1, 64], strides = [1, 1]} : vector<5x64xf32> to vector<1x64xf32>
    %91 = vector.broadcast %90 : vector<1x64xf32> to vector<8x64xf32>
    %92 = arith.mulf %89, %91 : vector<8x64xf32>
    %93 = vector.extract_strided_slice %65 {offsets = [0, 3], sizes = [8, 1], strides = [1, 1]} : vector<8x5xf32> to vector<8x1xf32>
    %94 = vector.broadcast %93 : vector<8x1xf32> to vector<8x64xf32>
    %95 = arith.mulf %92, %94 : vector<8x64xf32>
    %96 = arith.addf %88, %95 : vector<8x64xf32>
    %c48_i32 = arith.constant 48 : i32
    %97 = tpu.dynamic_rotate %64 by %c48_i32 dim 1 : vector<8x64xf32>, i32 -> vector<8x64xf32>
    %98 = vector.extract_strided_slice %66 {offsets = [4, 0], sizes = [1, 64], strides = [1, 1]} : vector<5x64xf32> to vector<1x64xf32>
    %99 = vector.broadcast %98 : vector<1x64xf32> to vector<8x64xf32>
    %100 = arith.mulf %97, %99 : vector<8x64xf32>
    %101 = vector.extract_strided_slice %65 {offsets = [0, 4], sizes = [8, 1], strides = [1, 1]} : vector<8x5xf32> to vector<8x1xf32>
    %102 = vector.broadcast %101 : vector<8x1xf32> to vector<8x64xf32>
    %103 = arith.mulf %100, %102 : vector<8x64xf32>
    %104 = arith.addf %96, %103 : vector<8x64xf32>
    %c0_24 = arith.constant 0 : index
    %c0_25 = arith.constant 0 : index
    %105 = vector.load %arg18[%c0_24, %c0_25] : memref<8x1xf32, #tpu.memory_space<vmem>>, vector<8x1xf32>
    %106 = vector.broadcast %105 : vector<8x1xf32> to vector<8x64xf32>
    %107 = arith.addf %104, %106 : vector<8x64xf32>
    %108 = arith.negf %107 : vector<8x64xf32>
    %109 = math.exp %108 : vector<8x64xf32>
    %cst_26 = arith.constant 1.000000e+00 : f32
    %110 = vector.broadcast %cst_26 : f32 to vector<8x64xf32>
    %111 = arith.addf %110, %109 : vector<8x64xf32>
    %112 = arith.divf %110, %111 : vector<8x64xf32>
    %113 = arith.truncf %112 : vector<8x64xf32> to vector<8x64xbf16>
    %114 = arith.extf %113 : vector<8x64xbf16> to vector<8x64xf32>
    %115 = arith.subf %112, %114 : vector<8x64xf32>
    %c0_27 = arith.constant 0 : index
    %c0_28 = arith.constant 0 : index
    %116 = vector.load %arg3[%c0_27, %c0_28] : memref<64x256xf32, #tpu.memory_space<vmem>>, vector<64x256xf32>
    %cst_29 = arith.constant dense<0.000000e+00> : vector<8x256xf32>
    %117 = tpu.matmul %114, %116, %cst_29 {dimension_numbers = #tpu.dot_dimension_numbers<[1], [0], [0], [1], [0, 0, 1, 1], [], []>} : vector<8x64xf32>, vector<64x256xf32>, vector<8x256xf32> -> vector<8x256xf32>
    %cst_30 = arith.constant dense<0.000000e+00> : vector<8x256xf32>
    %118 = tpu.matmul %115, %116, %cst_30 {dimension_numbers = #tpu.dot_dimension_numbers<[1], [0], [0], [1], [0, 0, 1, 1], [], []>} : vector<8x64xf32>, vector<64x256xf32>, vector<8x256xf32> -> vector<8x256xf32>
    %119 = arith.addf %117, %118 : vector<8x256xf32>
    %c0_31 = arith.constant 0 : index
    %c0_32 = arith.constant 0 : index
    %120 = vector.load %arg7[%c0_31, %c0_32] : memref<4x4xf32, #tpu.memory_space<vmem>>, vector<4x4xf32>
    %c0_33 = arith.constant 0 : index
    %c0_34 = arith.constant 0 : index
    %121 = vector.load %arg8[%c0_33, %c0_34] : memref<4x4xf32, #tpu.memory_space<vmem>>, vector<4x4xf32>
    %cst_35 = arith.constant dense<0.000000e+00> : vector<4x256xf32>
    %122 = tpu.matmul %120, %3, %cst_35 {dimension_numbers = #tpu.dot_dimension_numbers<[1], [0], [0], [1], [0, 0, 1, 1], [], []>} : vector<4x4xf32>, vector<4x256xf32>, vector<4x256xf32> -> vector<4x256xf32>
    %cst_36 = arith.constant dense<0.000000e+00> : vector<4x256xf32>
    %123 = tpu.matmul %120, %4, %cst_36 {dimension_numbers = #tpu.dot_dimension_numbers<[1], [0], [0], [1], [0, 0, 1, 1], [], []>} : vector<4x4xf32>, vector<4x256xf32>, vector<4x256xf32> -> vector<4x256xf32>
    %124 = arith.addf %122, %123 : vector<4x256xf32>
    %cst_37 = arith.constant dense<0.000000e+00> : vector<4x256xf32>
    %125 = tpu.matmul %121, %3, %cst_37 {dimension_numbers = #tpu.dot_dimension_numbers<[1], [0], [0], [1], [0, 0, 1, 1], [], []>} : vector<4x4xf32>, vector<4x256xf32>, vector<4x256xf32> -> vector<4x256xf32>
    %126 = arith.addf %124, %125 : vector<4x256xf32>
    %c0_38 = arith.constant 0 : index
    %c0_39 = arith.constant 0 : index
    %127 = vector.load %arg9[%c0_38, %c0_39] : memref<4x1xf32, #tpu.memory_space<vmem>>, vector<4x1xf32>
    %128 = vector.broadcast %127 : vector<4x1xf32> to vector<4x256xf32>
    %129 = arith.addf %126, %128 : vector<4x256xf32>
    %cst_40 = arith.constant 0.000000e+00 : f32
    %130 = vector.broadcast %cst_40 : f32 to vector<4x256xf32>
    %131 = arith.maximumf %129, %130 : vector<4x256xf32>
    %132 = vector.extract_strided_slice %119 {offsets = [0, 0], sizes = [4, 256], strides = [1, 1]} : vector<8x256xf32> to vector<4x256xf32>
    %133 = arith.mulf %131, %132 : vector<4x256xf32>
    %c0_41 = arith.constant 0 : index
    %c0_42 = arith.constant 0 : index
    %c0_43 = arith.constant 0 : index
    %134 = vector.load %arg19[%c0_41, %c0_42, %c0_43] : memref<1x8x256xf32, #tpu.memory_space<vmem>>, vector<1x4x256xf32>
    %135 = vector.shape_cast %134 : vector<1x4x256xf32> to vector<4x256xf32>
    %136 = vector.shape_cast %133 : vector<4x256xf32> to vector<1x4x256xf32>
    tpu.vector_store %arg19[%c0_41, %c0_42, %c0_43], %136 {strides = array<i32>} : memref<1x8x256xf32, #tpu.memory_space<vmem>>, vector<1x4x256xf32>,
    %c0_44 = arith.constant 0 : index
    %c0_45 = arith.constant 0 : index
    %137 = vector.load %arg10[%c0_44, %c0_45] : memref<4x9xf32, #tpu.memory_space<vmem>>, vector<4x9xf32>
    %c0_46 = arith.constant 0 : index
    %c0_47 = arith.constant 0 : index
    %138 = vector.load %arg4[%c0_46, %c0_47] : memref<9x256xf32, #tpu.memory_space<vmem>>, vector<9x256xf32>
    %c17_i32 = arith.constant 17 : i32
    %139 = tpu.dynamic_rotate %131 by %c17_i32 dim 1 : vector<4x256xf32>, i32 -> vector<4x256xf32>
    %140 = vector.extract_strided_slice %138 {offsets = [0, 0], sizes = [1, 256], strides = [1, 1]} : vector<9x256xf32> to vector<1x256xf32>
    %141 = vector.broadcast %140 : vector<1x256xf32> to vector<4x256xf32>
    %142 = arith.mulf %139, %141 : vector<4x256xf32>
    %143 = vector.extract_strided_slice %137 {offsets = [0, 0], sizes = [4, 1], strides = [1, 1]} : vector<4x9xf32> to vector<4x1xf32>
    %144 = vector.broadcast %143 : vector<4x1xf32> to vector<4x256xf32>
    %145 = arith.mulf %142, %144 : vector<4x256xf32>
    %c16_i32_48 = arith.constant 16 : i32
    %146 = tpu.dynamic_rotate %131 by %c16_i32_48 dim 1 : vector<4x256xf32>, i32 -> vector<4x256xf32>
    %147 = vector.extract_strided_slice %138 {offsets = [1, 0], sizes = [1, 256], strides = [1, 1]} : vector<9x256xf32> to vector<1x256xf32>
    %148 = vector.broadcast %147 : vector<1x256xf32> to vector<4x256xf32>
    %149 = arith.mulf %146, %148 : vector<4x256xf32>
    %150 = vector.extract_strided_slice %137 {offsets = [0, 1], sizes = [4, 1], strides = [1, 1]} : vector<4x9xf32> to vector<4x1xf32>
    %151 = vector.broadcast %150 : vector<4x1xf32> to vector<4x256xf32>
    %152 = arith.mulf %149, %151 : vector<4x256xf32>
    %153 = arith.addf %145, %152 : vector<4x256xf32>
    %c15_i32 = arith.constant 15 : i32
    %154 = tpu.dynamic_rotate %131 by %c15_i32 dim 1 : vector<4x256xf32>, i32 -> vector<4x256xf32>
    %155 = vector.extract_strided_slice %138 {offsets = [2, 0], sizes = [1, 256], strides = [1, 1]} : vector<9x256xf32> to vector<1x256xf32>
    %156 = vector.broadcast %155 : vector<1x256xf32> to vector<4x256xf32>
    %157 = arith.mulf %154, %156 : vector<4x256xf32>
    %158 = vector.extract_strided_slice %137 {offsets = [0, 2], sizes = [4, 1], strides = [1, 1]} : vector<4x9xf32> to vector<4x1xf32>
    %159 = vector.broadcast %158 : vector<4x1xf32> to vector<4x256xf32>
    %160 = arith.mulf %157, %159 : vector<4x256xf32>
    %161 = arith.addf %153, %160 : vector<4x256xf32>
    %c1_i32_49 = arith.constant 1 : i32
    %162 = tpu.dynamic_rotate %131 by %c1_i32_49 dim 1 : vector<4x256xf32>, i32 -> vector<4x256xf32>
    %163 = vector.extract_strided_slice %138 {offsets = [3, 0], sizes = [1, 256], strides = [1, 1]} : vector<9x256xf32> to vector<1x256xf32>
    %164 = vector.broadcast %163 : vector<1x256xf32> to vector<4x256xf32>
    %165 = arith.mulf %162, %164 : vector<4x256xf32>
    %166 = vector.extract_strided_slice %137 {offsets = [0, 3], sizes = [4, 1], strides = [1, 1]} : vector<4x9xf32> to vector<4x1xf32>
    %167 = vector.broadcast %166 : vector<4x1xf32> to vector<4x256xf32>
    %168 = arith.mulf %165, %167 : vector<4x256xf32>
    %169 = arith.addf %161, %168 : vector<4x256xf32>
    %170 = vector.extract_strided_slice %138 {offsets = [4, 0], sizes = [1, 256], strides = [1, 1]} : vector<9x256xf32> to vector<1x256xf32>
    %171 = vector.broadcast %170 : vector<1x256xf32> to vector<4x256xf32>
    %172 = arith.mulf %131, %171 : vector<4x256xf32>
    %173 = vector.extract_strided_slice %137 {offsets = [0, 4], sizes = [4, 1], strides = [1, 1]} : vector<4x9xf32> to vector<4x1xf32>
    %174 = vector.broadcast %173 : vector<4x1xf32> to vector<4x256xf32>
    %175 = arith.mulf %172, %174 : vector<4x256xf32>
    %176 = arith.addf %169, %175 : vector<4x256xf32>
    %c255_i32 = arith.constant 255 : i32
    %177 = tpu.dynamic_rotate %131 by %c255_i32 dim 1 : vector<4x256xf32>, i32 -> vector<4x256xf32>
    %178 = vector.extract_strided_slice %138 {offsets = [5, 0], sizes = [1, 256], strides = [1, 1]} : vector<9x256xf32> to vector<1x256xf32>
    %179 = vector.broadcast %178 : vector<1x256xf32> to vector<4x256xf32>
    %180 = arith.mulf %177, %179 : vector<4x256xf32>
    %181 = vector.extract_strided_slice %137 {offsets = [0, 5], sizes = [4, 1], strides = [1, 1]} : vector<4x9xf32> to vector<4x1xf32>
    %182 = vector.broadcast %181 : vector<4x1xf32> to vector<4x256xf32>
    %183 = arith.mulf %180, %182 : vector<4x256xf32>
    %184 = arith.addf %176, %183 : vector<4x256xf32>
    %c241_i32 = arith.constant 241 : i32
    %185 = tpu.dynamic_rotate %131 by %c241_i32 dim 1 : vector<4x256xf32>, i32 -> vector<4x256xf32>
    %186 = vector.extract_strided_slice %138 {offsets = [6, 0], sizes = [1, 256], strides = [1, 1]} : vector<9x256xf32> to vector<1x256xf32>
    %187 = vector.broadcast %186 : vector<1x256xf32> to vector<4x256xf32>
    %188 = arith.mulf %185, %187 : vector<4x256xf32>
    %189 = vector.extract_strided_slice %137 {offsets = [0, 6], sizes = [4, 1], strides = [1, 1]} : vector<4x9xf32> to vector<4x1xf32>
    %190 = vector.broadcast %189 : vector<4x1xf32> to vector<4x256xf32>
    %191 = arith.mulf %188, %190 : vector<4x256xf32>
    %192 = arith.addf %184, %191 : vector<4x256xf32>
    %c240_i32 = arith.constant 240 : i32
    %193 = tpu.dynamic_rotate %131 by %c240_i32 dim 1 : vector<4x256xf32>, i32 -> vector<4x256xf32>
    %194 = vector.extract_strided_slice %138 {offsets = [7, 0], sizes = [1, 256], strides = [1, 1]} : vector<9x256xf32> to vector<1x256xf32>
    %195 = vector.broadcast %194 : vector<1x256xf32> to vector<4x256xf32>
    %196 = arith.mulf %193, %195 : vector<4x256xf32>
    %197 = vector.extract_strided_slice %137 {offsets = [0, 7], sizes = [4, 1], strides = [1, 1]} : vector<4x9xf32> to vector<4x1xf32>
    %198 = vector.broadcast %197 : vector<4x1xf32> to vector<4x256xf32>
    %199 = arith.mulf %196, %198 : vector<4x256xf32>
    %200 = arith.addf %192, %199 : vector<4x256xf32>
    %c239_i32 = arith.constant 239 : i32
    %201 = tpu.dynamic_rotate %131 by %c239_i32 dim 1 : vector<4x256xf32>, i32 -> vector<4x256xf32>
    %202 = vector.extract_strided_slice %138 {offsets = [8, 0], sizes = [1, 256], strides = [1, 1]} : vector<9x256xf32> to vector<1x256xf32>
    %203 = vector.broadcast %202 : vector<1x256xf32> to vector<4x256xf32>
    %204 = arith.mulf %201, %203 : vector<4x256xf32>
    %205 = vector.extract_strided_slice %137 {offsets = [0, 8], sizes = [4, 1], strides = [1, 1]} : vector<4x9xf32> to vector<4x1xf32>
    %206 = vector.broadcast %205 : vector<4x1xf32> to vector<4x256xf32>
    %207 = arith.mulf %204, %206 : vector<4x256xf32>
    %208 = arith.addf %200, %207 : vector<4x256xf32>
    %c0_50 = arith.constant 0 : index
    %c0_51 = arith.constant 0 : index
    %209 = vector.load %arg11[%c0_50, %c0_51] : memref<4x1xf32, #tpu.memory_space<vmem>>, vector<4x1xf32>
    %210 = vector.broadcast %209 : vector<4x1xf32> to vector<4x256xf32>
    %211 = arith.addf %208, %210 : vector<4x256xf32>
    %cst_52 = arith.constant 0.000000e+00 : f32
    %212 = vector.broadcast %cst_52 : f32 to vector<4x256xf32>
    %213 = arith.maximumf %211, %212 : vector<4x256xf32>
    %214 = vector.extract_strided_slice %119 {offsets = [4, 0], sizes = [4, 256], strides = [1, 1]} : vector<8x256xf32> to vector<4x256xf32>
    %215 = arith.mulf %213, %214 : vector<4x256xf32>
    %c0_53 = arith.constant 0 : index
    %c4 = arith.constant 4 : index
    %c0_54 = arith.constant 0 : index
    %216 = vector.load %arg19[%c0_53, %c4, %c0_54] : memref<1x8x256xf32, #tpu.memory_space<vmem>>, vector<1x4x256xf32>
    %217 = vector.shape_cast %216 : vector<1x4x256xf32> to vector<4x256xf32>
    %218 = vector.shape_cast %215 : vector<4x256xf32> to vector<1x4x256xf32>
    tpu.vector_store %arg19[%c0_53, %c4, %c0_54], %218 {strides = array<i32>} : memref<1x8x256xf32, #tpu.memory_space<vmem>>, vector<1x4x256xf32>,
    return
  }
  func.func @transform_0(%arg0: i32) -> (i32, i32, i32) {
    %c0_i32 = arith.constant 0 : i32
    %c0_i32_0 = arith.constant 0 : i32
    %c0_i32_1 = arith.constant 0 : i32
    return %arg0, %c0_i32, %c0_i32_0 : i32, i32, i32
  }
  func.func @transform_1(%arg0: i32) -> (i32, i32) {
    %c0_i32 = arith.constant 0 : i32
    %c0_i32_0 = arith.constant 0 : i32
    %c0_i32_1 = arith.constant 0 : i32
    return %c0_i32, %c0_i32_0 : i32, i32
  }
  func.func @transform_2(%arg0: i32) -> (i32, i32) {
    %c0_i32 = arith.constant 0 : i32
    %c0_i32_0 = arith.constant 0 : i32
    %c0_i32_1 = arith.constant 0 : i32
    return %c0_i32, %c0_i32_0 : i32, i32
  }
  func.func @transform_3(%arg0: i32) -> (i32, i32) {
    %c0_i32 = arith.constant 0 : i32
    %c0_i32_0 = arith.constant 0 : i32
    %c0_i32_1 = arith.constant 0 : i32
    return %c0_i32, %c0_i32_0 : i32, i32
  }
  func.func @transform_4(%arg0: i32) -> (i32, i32) {
    %c0_i32 = arith.constant 0 : i32
    %c0_i32_0 = arith.constant 0 : i32
    %c0_i32_1 = arith.constant 0 : i32
    return %c0_i32, %c0_i32_0 : i32, i32
  }
  func.func @transform_5(%arg0: i32) -> (i32, i32) {
    %c0_i32 = arith.constant 0 : i32
    %c0_i32_0 = arith.constant 0 : i32
    %c0_i32_1 = arith.constant 0 : i32
    return %c0_i32, %c0_i32_0 : i32, i32
  }
  func.func @transform_6(%arg0: i32) -> (i32, i32) {
    %c0_i32 = arith.constant 0 : i32
    %c0_i32_0 = arith.constant 0 : i32
    %c0_i32_1 = arith.constant 0 : i32
    return %c0_i32, %c0_i32_0 : i32, i32
  }
  func.func @transform_7(%arg0: i32) -> (i32, i32) {
    %c0_i32 = arith.constant 0 : i32
    %c0_i32_0 = arith.constant 0 : i32
    %c0_i32_1 = arith.constant 0 : i32
    return %c0_i32, %c0_i32_0 : i32, i32
  }
  func.func @transform_8(%arg0: i32) -> (i32, i32) {
    %c0_i32 = arith.constant 0 : i32
    %c0_i32_0 = arith.constant 0 : i32
    %c0_i32_1 = arith.constant 0 : i32
    return %c0_i32, %c0_i32_0 : i32, i32
  }
  func.func @transform_9(%arg0: i32) -> (i32, i32) {
    %c0_i32 = arith.constant 0 : i32
    %c0_i32_0 = arith.constant 0 : i32
    %c0_i32_1 = arith.constant 0 : i32
    return %c0_i32, %c0_i32_0 : i32, i32
  }
  func.func @transform_10(%arg0: i32) -> (i32, i32) {
    %c0_i32 = arith.constant 0 : i32
    %c0_i32_0 = arith.constant 0 : i32
    %c0_i32_1 = arith.constant 0 : i32
    return %c0_i32, %c0_i32_0 : i32, i32
  }
  func.func @transform_11(%arg0: i32) -> (i32, i32) {
    %c0_i32 = arith.constant 0 : i32
    %c0_i32_0 = arith.constant 0 : i32
    %c0_i32_1 = arith.constant 0 : i32
    return %c0_i32, %c0_i32_0 : i32, i32
  }
  func.func @transform_12(%arg0: i32) -> (i32, i32) {
    %c0_i32 = arith.constant 0 : i32
    %c0_i32_0 = arith.constant 0 : i32
    %c0_i32_1 = arith.constant 0 : i32
    return %c0_i32, %c0_i32_0 : i32, i32
  }
  func.func @transform_13(%arg0: i32) -> (i32, i32) {
    %c0_i32 = arith.constant 0 : i32
    %c0_i32_0 = arith.constant 0 : i32
    %c0_i32_1 = arith.constant 0 : i32
    return %c0_i32, %c0_i32_0 : i32, i32
  }
  func.func @transform_14(%arg0: i32) -> (i32, i32) {
    %c0_i32 = arith.constant 0 : i32
    %c0_i32_0 = arith.constant 0 : i32
    %c0_i32_1 = arith.constant 0 : i32
    return %c0_i32, %c0_i32_0 : i32, i32
  }
  func.func @transform_15(%arg0: i32) -> (i32, i32) {
    %c0_i32 = arith.constant 0 : i32
    %c0_i32_0 = arith.constant 0 : i32
    %c0_i32_1 = arith.constant 0 : i32
    return %c0_i32, %c0_i32_0 : i32, i32
  }
  func.func @transform_16(%arg0: i32) -> (i32, i32) {
    %c0_i32 = arith.constant 0 : i32
    %c0_i32_0 = arith.constant 0 : i32
    %c0_i32_1 = arith.constant 0 : i32
    return %c0_i32, %c0_i32_0 : i32, i32
  }
  func.func @transform_17(%arg0: i32) -> (i32, i32) {
    %c0_i32 = arith.constant 0 : i32
    %c0_i32_0 = arith.constant 0 : i32
    %c0_i32_1 = arith.constant 0 : i32
    return %c0_i32, %c0_i32_0 : i32, i32
  }
  func.func @transform_18(%arg0: i32) -> (i32, i32, i32) {
    %c0_i32 = arith.constant 0 : i32
    %c0_i32_0 = arith.constant 0 : i32
    %c0_i32_1 = arith.constant 0 : i32
    return %arg0, %c0_i32, %c0_i32_0 : i32, i32, i32
  }
}

</mosaic_0001>

<bundles_post_ra>
// kernel: tpu_custom_call.1
= control target key start
LH: loop header
LB: loop body
LE: loop exit
PB: predicated region body
PF: predicated region fallthrough
CT: control target
= control target key end

     0   :  { %s2316_s0 = inlined_call_operand.vmem [shape: f32[2,4,256], index: 0, kind: input, shape index: {}]   ;;  %s2317_s1 = inlined_call_operand.vmem [shape: f32[256,64], index: 1, kind: input, shape index: {}]   ;;  %s2318_s2 = inlined_call_operand.vmem [shape: f32[64,256], index: 2, kind: input, shape index: {}]   ;;  %s2319_s3 = inlined_call_operand.vmem [shape: f32[9,256], index: 3, kind: input, shape index: {}]   ;;  %s2320_s4 = inlined_call_operand.vmem [shape: f32[5,64], index: 4, kind: input, shape index: {}]   ;;  %s2321_s5 = inlined_call_operand.vmem [shape: f32[5,64], index: 5, kind: input, shape index: {}]   ;;  %s2322_s6 = inlined_call_operand.vmem [shape: f32[4,4], index: 6, kind: input, shape index: {}]   ;;  %s2323_s7 = inlined_call_operand.vmem [shape: f32[4,4], index: 7, kind: input, shape index: {}]   ;;  %s2324_s8 = inlined_call_operand.vmem [shape: f32[4,1], index: 8, kind: input, shape index: {}]   ;;  %s2325_s9 = inlined_call_operand.vmem [shape: f32[4,9], index: 9, kind: input, shape index: {}]   ;;  %s2326_s10 = inlined_call_operand.vmem [shape: f32[4,1], index: 10, kind: input, shape index: {}]   ;;  %s2327_s11 = inlined_call_operand.vmem [shape: f32[8,4], index: 11, kind: input, shape index: {}]   ;;  %s2328_s12 = inlined_call_operand.vmem [shape: f32[8,4], index: 12, kind: input, shape index: {}]   ;;  %s2329_s13 = inlined_call_operand.vmem [shape: f32[8,1], index: 13, kind: input, shape index: {}]   ;;  %s2330_s14 = inlined_call_operand.vmem [shape: f32[8,5], index: 14, kind: input, shape index: {}]   ;;  %s2331_s15 = inlined_call_operand.vmem [shape: f32[8,1], index: 15, kind: input, shape index: {}]   ;;  %s2332_s16 = inlined_call_operand.vmem [shape: f32[8,5], index: 16, kind: input, shape index: {}]   ;;  %s2333_s17 = inlined_call_operand.vmem [shape: f32[8,1], index: 17, kind: input, shape index: {}]   ;;  %s2334_s18 = inlined_call_operand.hbm [shape: f32[2,8,256], index: 18, kind: output, shape index: {}]  }
   0x1   :  { %2350 = sst [smem:[#allocation12_spill]] %s2316_s0 }
   0x2   :  { %2351 = sst [smem:[#allocation13_spill]] %s2317_s1 }
   0x3   :  { %2352 = sst [smem:[#allocation14_spill]] %s2318_s2 }
   0x4   :  { %2353 = sst [smem:[#allocation15_spill]] %s2319_s3 }
   0x5   :  { %2354 = sst [smem:[#allocation16_spill]] %s2320_s4 }
   0x6   :  { %2355 = sst [smem:[#allocation17_spill]] %s2321_s5 }
   0x7   :  { %2356 = sst [smem:[#allocation18_spill]] %s2334_s18 }
   0x8   :  { %23 = vsyncpa [#allocation3], 0 }
   0x9   :  { %25 = vsyncpa [#allocation3 + $0x1], 0  ;;  %s1859_s27 = smov 0   ;;  %s1861_s28 = smov 0  }
   0xa   :  { %s1863_s29 = smov 0   ;;  %s1865_s30 = smov 0  }
   0xb LB: > { %2357 = sst [smem:[#allocation5_spill]] %s1718_s27  ;;  %s1880_s0 = sadd.s32 4294967295, %s1730_s30   ;;  %s1730_s30 = sphi %s1865_s30, %s2380_s30   ;;  %s1726_s29 = sphi %s1863_s29, %s2382_s29   ;;  %s1722_s28 = sphi %s1861_s28, %s2384_s28   ;;  %s1718_s27 = sphi %s1859_s27, %s2383_s27  }
   0xc   : > { %2358 = sst [smem:[#allocation6_spill]] %s1726_s29  ;;  %s1534_s19 = sadd.s32 4294967294, %s1730_s30  }
   0xd   : > { %2359 = sst [smem:[#allocation7_spill]] %s1730_s30  ;;  %s1884_s1 = sadd.s32 1, %s1730_s30  }
   0xe   : > { %2360 = sst [smem:[#allocation8_spill]] %s1884_s1  ;;  %s421_s20 = sadd.s32 1, %s1726_s29 }
   0xf   : > { %s418_s21 = ssub.s32 %s1730_s30, %s1884_s1  ;;  %p431_p0 = scmp.ne.s32.totalorder %s1726_s29, %s1722_s28 }
  0x10   : > { %p419_p1 = scmp.eq.s32.totalorder %s418_s21, 0  ;;  %p432_p2 = scmp.eq.s32.totalorder %s1880_s0, 1 }
  0x11   : > { %p437_p3 = scmp.ne.s32.totalorder %s1722_s28, %s1718_s27  ;;  %p438_p4 = scmp.eq.s32.totalorder %s1534_s19, 1 }
  0x12   : > { %s1895_s22 = scalar_select %p419_p1, %s1726_s29, %s421_s20  }
  0x13   : > { %p1897_p5 = por %p432_p2, %p431_p0  ;;  %p1901_p6 = por %p438_p4, %p437_p3 }
  0x14   : > { %2361 = sst [smem:[#allocation9_spill]] %s1895_s22  ;;  %p1537_p7 = scmp.ge.s32.totalorder %s1730_s30, 1 }
  0x15   : > { %s2362_s2 = scalar_select %p1897_p5, 1, 0 }
  0x16   : > { %s2364_s23 = scalar_select %p1901_p6, 1, 0 }
  0x17   : > { %2363 = sst [smem:[#allocation10_spill]] %s2362_s2  ;;  %p515_p8 = scmp.lt.s32.totalorder %s1730_s30, 3 }
  0x18   : > { %2365 = sst [smem:[#allocation11_spill]] %s2364_s23 }
  0x19   : > { %p516_p9 = pnand %p1537_p7, %p515_p8 }
  0x1a   : > { %s2366_s26 = sld [smem:[#allocation13_spill]] (!%p516_p9)  ;;  %p569_p10 = scmp.lt.s32.totalorder (!%p516_p9), %s1880_s0, 1 }
  0x1b   : > { %519 = sbr.rel (%p516_p9) target bundleno = 1645 (0x66d), region = 92  ;;  %s2367_s30 = sld [smem:[#allocation12_spill]] (!%p516_p9) }
  0x1c   : > { %s2368_s4 = sld [smem:[#allocation16_spill]] (!%p516_p9)  ;;  %s1736_s1 = smov (!%p516_p9), 64  }
  0x1d   : > { %s1737_s23 = smov (!%p516_p9), 62   ;;  %s1738_s24 = smov (!%p516_p9), 63  }
  0x1e   : > { %s2348_s25 = smov (!%p516_p9), 1   ;;  %s2369_s5 = sld [smem:[#allocation17_spill]] (!%p516_p9) }
  0x1f   : > { %s2346_s19 = smov (!%p516_p9), 127   ;;  %s1743_s22 = smov (!%p516_p9), 61  }
  0x20   : > { %v606_v0 = vld [vmem:[%s2366_s26 + $0x78] sm:$0xff]  ;;  %v605_v1 = vld [vmem:[%s2366_s26 + $0x70] sm:$0xff]  ;;  %v604_v4 = vld [vmem:[%s2366_s26 + $0x68] sm:$0xff]  ;;  %s570_s20 = scalar_select %p569_p10, %s1880_s0, 1  ;;  %vm587_vm0 = vcmask 1043456   ;;  %v1732_v45 = vmov 0  }
  0x21   : > { %v622_v2 = vld [vmem:[%s2366_s26 + $0xf8] sm:$0xff]  ;;  %669 = vmatpush.msra.mxu2 %v606_v0  ;;  %v621_v3 = vld [vmem:[%s2366_s26 + $0xf0] sm:$0xff]  ;;  %629 = vmatpush.msra.mxu0 %v606_v0  ;;  %v620_v5 = vld [vmem:[%s2366_s26 + $0xe8] sm:$0xff]  ;;  %v1733_v46 = vmov 1   ;;  %v1734_v47 = vmov 2   ;;  %vm714_vm1 = vcmask 31744  }
  0x22   : > { %689 = vmatpush.msra.mxu3 %v622_v2  ;;  %649 = vmatpush.msra.mxu1 %v622_v2  ;;  %v603_v6 = vld [vmem:[%s2366_s26 + $0x60] sm:$0xff]  ;;  %s1569_s27 = sshll.u32 %s570_s20, 3  ;;  %v602_v8 = vld [vmem:[%s2366_s26 + $0x58] sm:$0xff]  ;;  %v601_v10 = vld [vmem:[%s2366_s26 + $0x50] sm:$0xff]  ;;  %s1735_s20 = smov 2   ;;  %vm797_vm2 = vcmask 1048064  }
  0x23   : > { %670 = vmatpush.msra.mxu2 %v605_v1  ;;  %630 = vmatpush.msra.mxu0 %v605_v1  ;;  %v619_v7 = vld [vmem:[%s2366_s26 + $0xe0] sm:$0xff]  ;;  %v618_v9 = vld [vmem:[%s2366_s26 + $0xd8] sm:$0xff]  ;;  %s573_s29 = scalar_lea.vmem %s2367_s30, %s1569_s27  ;;  %v617_v11 = vld [vmem:[%s2366_s26 + $0xd0] sm:$0xff]  ;;  %s1744_s21 = smov 60   ;;  %vm1019_vm7 = vcmask 523264  }
  0x24   : > { %690 = vmatpush.msra.mxu3 %v621_v3  ;;  %650 = vmatpush.msra.mxu1 %v621_v3  ;;  %v600_v12 = vld [vmem:[%s2366_s26 + $0x48] sm:$0xff]  ;;  %v574_v14 = vld [vmem:[%s573_s29] sm:$0xff]  ;;  %v598_v17 = vld [vmem:[%s2366_s26 + $0x38] sm:$0xff]  ;;  %s1745_s29 = smov 66   ;;  %s1747_s27 = smov 48  }
  0x25   : > { %671 = vmatpush.msra.mxu2 %v604_v4  ;;  %631 = vmatpush.msra.mxu0 %v604_v4  ;;  %v616_v13 = vld [vmem:[%s2366_s26 + $0xc8] sm:$0xff]  ;;  %576 = vst [vmem:[#allocation1] ss:$2 sm:$0xff] %v574_v14  ;;  %v599_v15 = vld [vmem:[%s2366_s26 + $0x40] sm:$0xff]  ;;  %v614_v18 = vld [vmem:[%s2366_s26 + $0xb8] sm:$0xff]  ;;  %s1748_s18 = smov 8  }
  0x26   : > { %691 = vmatpush.msra.mxu3 %v620_v5  ;;  %651 = vmatpush.msra.mxu1 %v620_v5  ;;  %v615_v16 = vld [vmem:[%s2366_s26 + $0xc0] sm:$0xff]  ;;  %v597_v19 = vld [vmem:[%s2366_s26 + $0x30] sm:$0xff]  ;;  %v596_v21 = vld [vmem:[%s2366_s26 + $0x28] sm:$0xff]  ;;  %s1749_s30 = smov 114   ;;  %s1750_s2 = smov 16  }
  0x27   : > { %672 = vmatpush.msra.mxu2 %v603_v6  ;;  %632 = vmatpush.msra.mxu0 %v603_v6  ;;  %v613_v20 = vld [vmem:[%s2366_s26 + $0xb0] sm:$0xff]  ;;  %v612_v22 = vld [vmem:[%s2366_s26 + $0xa8] sm:$0xff]  ;;  %v595_v26 = vld [vmem:[%s2366_s26 + $0x20] sm:$0xff]  ;;  %s2374_s3 = sld [smem:[#allocation15_spill]] }
  0x28   : > { %692 = vmatpush.msra.mxu3 %v619_v7  ;;  %652 = vmatpush.msra.mxu1 %v619_v7  ;;  %v611_v27 = vld [vmem:[%s2366_s26 + $0xa0] sm:$0xff]  ;;  %v594_v30 = vld [vmem:[%s2366_s26 + $0x18] sm:$0xff]  ;;  %v593_v33 = vld [vmem:[%s2366_s26 + $0x10] sm:$0xff] }
  0x29   : > { %673 = vmatpush.msra.mxu2 %v602_v8  ;;  %633 = vmatpush.msra.mxu0 %v602_v8  ;;  %v610_v31 = vld [vmem:[%s2366_s26 + $0x98] sm:$0xff]  ;;  %v609_v34 = vld [vmem:[%s2366_s26 + $0x90] sm:$0xff]  ;;  %v592_v36 = vld [vmem:[%s2366_s26 + $0x8] sm:$0xff] }
  0x2a   : > { %693 = vmatpush.msra.mxu3 %v618_v9  ;;  %653 = vmatpush.msra.mxu1 %v618_v9  ;;  %v608_v37 = vld [vmem:[%s2366_s26 + $0x88] sm:$0xff]  ;;  %v591_v39 = vld [vmem:[%s2366_s26] sm:$0xff] }
  0x2b   : > { %674 = vmatpush.msra.mxu2 %v601_v10  ;;  %634 = vmatpush.msra.mxu0 %v601_v10  ;;  %v607_v40 = vld [vmem:[%s2366_s26 + $0x80] sm:$0xff] }
  0x2c   : > { %694 = vmatpush.msra.mxu3 %v617_v11  ;;  %654 = vmatpush.msra.mxu1 %v617_v11  ;;  %v577_v23 = vld.sshfl [vmem:[#allocation1] sm:$0xff pattern:$0x75316420]  ;;  %v578_v24 = vld.sshfl [vmem:[#allocation1 + $0x8] sm:$0xff pattern:$0x75316420] }
  0x2d   : > { %675 = vmatpush.msra.mxu2 %v600_v12  ;;  %635 = vmatpush.msra.mxu0 %v600_v12  ;;  %v581_v25 = vpack.c.bf16 %v578_v24, %v577_v23  ;;  %v788_v43 = vld [vmem:[%s2329_s13] sm:$0xff]  ;;  %v1740_v12 = vmov 4  }
  0x2e   : > { %695 = vmatpush.msra.mxu3 %v616_v13  ;;  %655 = vmatpush.msra.mxu1 %v616_v13  ;;  %v2023_v44 = vld [vmem:[%s2330_s14] sm:$0xff]  ;;  %v1741_v13 = vmov 3  }
  0x2f   : > { %676 = vmatpush.msra.mxu2 %v599_v15  ;;  %636 = vmatpush.msra.mxu0 %v599_v15  ;;  %v1984_v28 = vunpack.c.l.bf16 %v581_v25  ;;  %v1986_v29 = vunpack.c.h.bf16 %v581_v25  ;;  %v713_v57 = vld [vmem:[%s2328_s12] sm:$0xff] }
  0x30   : > { %696 = vmatpush.msra.mxu3 %v615_v16  ;;  %656 = vmatpush.msra.mxu1 %v615_v16  ;;  %v712_v58 = vld [vmem:[%s2327_s11] sm:$0xff] }
  0x31   : > { %677 = vmatpush.msra.mxu2 %v598_v17  ;;  %637 = vmatpush.msra.mxu0 %v598_v17  ;;  %v586_v32 = vrot.slane %v1986_v29, 4  ;;  %v796_v60 = vld [vmem:[%s2368_s4] sm:$0x1f] }
  0x32   : > { %697 = vmatpush.msra.mxu3 %v614_v18  ;;  %657 = vmatpush.msra.mxu1 %v614_v18  ;;  %v860_v61 = vperm.slane %v796_v60, 4  ;;  %v832_v5 = vperm.slane %v796_v60, 2  ;;  %v816_v10 = vperm.slane %v796_v60, 1  ;;  %v844_v11 = vperm.slane %v796_v60, 3  ;;  %v876_v17 = vld [vmem:[%s2331_s15] sm:$0xff] }
  0x33   : > { %678 = vmatpush.msra.mxu2 %v597_v19  ;;  %638 = vmatpush.msra.mxu0 %v597_v19  ;;  %v588_v35 = vsel %vm587_vm0, %v1984_v28, %v586_v32  ;;  %v804_v16 = vperm.slane %v796_v60, 0  ;;  %v2063_v18 = vld [vmem:[%s2369_s5] sm:$0x1f] }
  0x34   : > { %698 = vmatpush.msra.mxu3 %v613_v20  ;;  %658 = vmatpush.msra.mxu1 %v613_v20  ;;  %v590_v38 = vsub.f32 %v574_v14, %v588_v35  ;;  %v923_v20 = vperm.slane %v2063_v18, 2 }
  0x35   : > { %679 = vmatpush.msra.mxu2 %v596_v21  ;;  %639 = vmatpush.msra.mxu0 %v596_v21 }
  0x36   : > { %699 = vmatpush.msra.mxu3 %v612_v22  ;;  %659 = vmatpush.msra.mxu1 %v612_v22  ;;  %624 = vst [vmem:[#allocation1] ss:$2 sm:$0xff] %v590_v38 }
  0x37   : > { %680 = vmatpush.msra.mxu2 %v595_v26  ;;  %640 = vmatpush.msra.mxu0 %v595_v26 }
  0x38   : > { %700 = vmatpush.msra.mxu3 %v611_v27  ;;  %660 = vmatpush.msra.mxu1 %v611_v27 }
  0x39   : > { %681 = vmatpush.msra.mxu2 %v594_v30  ;;  %641 = vmatpush.msra.mxu0 %v594_v30 }
  0x3a   : > { %701 = vmatpush.msra.mxu3 %v610_v31  ;;  %661 = vmatpush.msra.mxu1 %v610_v31 }
  0x3b   : > { %682 = vmatpush.msra.mxu2 %v593_v33  ;;  %642 = vmatpush.msra.mxu0 %v593_v33 }
  0x3c   : > { %702 = vmatpush.msra.mxu3 %v609_v34  ;;  %662 = vmatpush.msra.mxu1 %v609_v34 }
  0x3d   : > { %683 = vmatpush.msra.mxu2 %v592_v36  ;;  %643 = vmatpush.msra.mxu0 %v592_v36  ;;  %v625_v41 = vld.sshfl [vmem:[#allocation1] sm:$0xff pattern:$0x75316420]  ;;  %v626_v42 = vld.sshfl [vmem:[#allocation1 + $0x8] sm:$0xff pattern:$0x75316420] }
  0x3e   : > { %703 = vmatpush.msra.mxu3 %v608_v37  ;;  %663 = vmatpush.msra.mxu1 %v608_v37  ;;  %1109 = vst [vmem:[#allocation1] ss:$2 sm:$0xff] %v590_v38 }
  0x3f   : > { %684 = vmatpush.msra.mxu2 %v591_v39  ;;  %644 = vmatpush.msra.mxu0 %v591_v39 }
  0x40   : > { %704 = vmatpush.msra.mxu3 %v607_v40  ;;  %685 = vmatmul.f32.vlgmr.msra.gmra.mxu2 %v1984_v28 }
  0x41   : > { %705 = vmatmul.f32.vlgmr.msra.gmra.mxu3 %v1986_v29  ;;  %664 = vmatpush.msra.mxu1 %v607_v40 }
  0x42   : > { %645 = vmatmul.f32.vlgmr.msra.gmra.mxu0 %v625_v41  ;;  %665 = vmatmul.f32.vlgmr.msra.gmra.mxu1 %v626_v42 }
  0x43   : > { %1642 = vset.pattern.permute.xlu0 %v1732_v45  ;;  %1643 = vset.pattern.permute.xlu2 %v1733_v46 }
  0x44   : > { %791 = vperm.xlu0 %1642, %v788_v43   ;;  %823 = vperm.xlu2 %1643, %v2023_v44  }
  0x45   : > { %818 = vrot.lane.b32.xlu1 %v816_v10, %s1738_s24 }
  0x46   : > { %1645 = vset.pattern.permute.xlu1 %v1741_v13 }
  0x4c   : > { %1644 = vset.pattern.permute.xlu2 %v1734_v47  ;;  %1646 = vset.pattern.permute.xlu0 %v1740_v12 }
  0x4d   : > { %835 = vperm.xlu2 %1644, %v2023_v44  }
  0x55   : > { %1647 = vset.pattern.permute.xlu2 %v1732_v45 }
  0x56   : > { %862 = vrot.lane.b32.xlu2 %v860_v61, %s1735_s20  ;;  %s1746_s20 = smov 56  }
  0x5e   : > { %812 = vperm.xlu2 %1647, %v2023_v44  }
  0x9e   : > { %v824_v63 = vpop.permute.xlu2 %823 }
  0xa7   : > { %v836_v7 = vpop.permute.xlu2 %835 }
  0xb0   : > { %v863_v26 = vpop.permute.xlu2 %862 }
  0xb6   : > { %v792_v3 = vpop.permute.xlu0 %791 }
  0xb7   : > { %v819_v19 = vpop.permute.xlu1 %818 }
  0xb8   : > { %v813_v35 = vpop.permute.xlu2 %812 }
  0xbf   : > { %v646_v48 = vpop.f32.mrf.mxu0  ;;  %v666_v49 = vpop.f32.mrf.mxu1 }
  0xc0   : > { %v667_v50 = vadd.f32 %v666_v49, %v646_v48 }
  0xc3   : > { %v686_v51 = vpop.f32.mrf.mxu2 }
  0xc4   : > { %v706_v52 = vpop.f32.mrf.mxu3  ;;  %v687_v53 = vadd.f32 %v686_v51, %v667_v50 }
  0xc6   : > { %v707_v54 = vadd.f32 %v706_v52, %v687_v53  ;;  %v907_v52 = vperm.slane %v2063_v18, 1  ;;  %v883_v53 = vld [vmem:[%s2332_s16] sm:$0xff] }
  0xc8   : > { %v709_v55 = vpack.c.bf16 %v707_v54, %v707_v54 }
  0xca   : > { %v710_v56 = vunpack.c.l.bf16 %v709_v55 }
  0xcc   : > { %v711_v59 = vsub.f32 %v707_v54, %v710_v56  ;;  %1543 = vmatpush.msk.msrb.mxu1 %vm587_vm0, %v710_v56  ;;  %1545 = vmatpush.msk.msrb.mxu2 %vm587_vm0, %v710_v56  ;;  %v895_v54 = vperm.slane %v2063_v18, 0 }
  0xcd   : > { %1546 = vmatmul.msk.f32.vlgmr.msrb.gmra.mxu2 %vm714_vm1, %v713_v57  ;;  %1544 = vmatmul.msk.f32.vlgmr.msrb.gmra.mxu1 %vm714_vm1, %v712_v58 }
  0xce   : > { %1541 = vmatpush.msk.msrb.mxu0 %vm587_vm0, %v711_v59 }
  0xcf   : > { %1542 = vmatmul.msk.f32.vlgmr.msrb.gmra.mxu0 %vm714_vm1, %v712_v58  ;;  %v939_v58 = vperm.slane %v2063_v18, 3 }
 0x14a   : > { %v761_v62 = vpop.f32.mrf.mxu1 }
 0x14c   : > { %v738_v0 = vpop.f32.mrf.mxu0 }
 0x14d   : > { %v762_v1 = vadd.f32 %v761_v62, %v738_v0  ;;  %v955_v62 = vperm.slane %v2063_v18, 4 }
 0x150   : > { %v784_v2 = vpop.f32.mrf.mxu2 }
 0x151   : > { %v787_v4 = vadd.f32 %v784_v2, %v762_v1 }
 0x153   : > { %v794_v6 = vadd.f32 %v792_v3, %v787_v4 }
 0x155   : > { %798 = vrot.lane.b32.xlu0 %v794_v6, %s1736_s1  ;;  %v833_v8 = vmul.f32 %v832_v5, %v794_v6 }
 0x157   : > { %v838_v9 = vmul.f32 %v836_v7, %v833_v8 }
 0x159   : > { %840 = vrot.lane.b32.xlu2 %v838_v9, %s1737_s23 }
 0x15d   : > { %846 = vrot.lane.b32.xlu0 %v844_v11, %s2348_s25  ;;  %s1763_s25 = smov 111  }
 0x161   : > { %879 = vperm.xlu2 %1647, %v876_v17  }
 0x165   : > { %867 = vperm.xlu0 %1646, %v2023_v44  }
 0x169   : > { %925 = vrot.lane.b32.xlu2 %v923_v20, %s1737_s23 }
 0x16a   : > { %1650 = vset.pattern.permute.xlu2 %v1741_v13 }
 0x16d   : > { %1649 = vset.pattern.permute.xlu0 %v1734_v47 }
 0x1b3   : > { %v841_v41 = vpop.permute.xlu2 %840 }
 0x1bb   : > { %v880_v50 = vpop.permute.xlu2 %879 }
 0x1c3   : > { %v926_v57 = vpop.permute.xlu2 %925 }
 0x1c7   : > { %v799_v14 = vpop.permute.xlu0 %798 }
 0x1c8   : > { %v800_v15 = vsel %vm797_vm2, %v799_v14, %v794_v6 }
 0x1c9   : > { %801 = vrot.lane.b32.xlu1 %v800_v15, %s1736_s1 }
 0x1cf   : > { %v847_v21 = vpop.permute.xlu0 %846 }
 0x1d1   : > { %851 = vperm.xlu1 %1645, %v2023_v44  }
 0x1d7   : > { %v868_v32 = vpop.permute.xlu0 %867 }
 0x1d9   : > { %806 = vrot.lane.b32.xlu1 %v804_v16, %s1737_s23  ;;  %s1754_s23 = smov 80  }
 0x1da   : > { %1648 = vset.pattern.permute.xlu1 %v1733_v46 }
 0x23b   : > { %v802_v22 = vpop.permute.xlu1 %801 }
 0x23c   : > { %v803_v23 = vsel %vm797_vm2, %v802_v22, %v794_v6 }
 0x23d   : > { %v821_v24 = vmul.f32 %v819_v19, %v803_v23  ;;  %v849_v27 = vmul.f32 %v847_v21, %v803_v23  ;;  %v865_v30 = vmul.f32 %v863_v26, %v803_v23 }
 0x23f   : > { %v826_v25 = vmul.f32 %v824_v63, %v821_v24  ;;  %v870_v34 = vmul.f32 %v868_v32, %v865_v30 }
 0x241   : > { %828 = vrot.lane.b32.xlu1 %v826_v25, %s2346_s19  ;;  %s1570_s19 = sshll.u32 %s1880_s0, 4 }
 0x243   : > { %v852_v31 = vpop.permute.xlu1 %851 }
 0x244   : > { %v854_v33 = vmul.f32 %v852_v31, %v849_v27 }
 0x246   : > { %856 = vrot.lane.b32.xlu0 %v854_v33, %s1743_s22  ;;  %s2373_s22 = smov 127  }
 0x249   : > { %872 = vrot.lane.b32.xlu1 %v870_v34, %s1744_s21  ;;  %s1762_s21 = smov 112  }
 0x24b   : > { %v807_v36 = vpop.permute.xlu1 %806 }
 0x24c   : > { %v809_v37 = vmul.f32 %v807_v36, %v803_v23 }
 0x24e   : > { %v815_v38 = vmul.f32 %v813_v35, %v809_v37 }
 0x2b3   : > { %v829_v39 = vpop.permute.xlu1 %828 }
 0x2b4   : > { %v831_v40 = vadd.f32 %v829_v39, %v815_v38 }
 0x2b6   : > { %v843_v42 = vadd.f32 %v841_v41, %v831_v40 }
 0x2b8   : > { %v857_v43 = vpop.permute.xlu0 %856 }
 0x2b9   : > { %v859_v44 = vadd.f32 %v857_v43, %v843_v42 }
 0x2bb   : > { %v873_v48 = vpop.permute.xlu1 %872 }
 0x2bc   : > { %v875_v49 = vadd.f32 %v873_v48, %v859_v44 }
 0x2be   : > { %v882_v51 = vadd.f32 %v880_v50, %v875_v49 }
 0x2c0   : > { %886 = vrot.lane.b32.xlu0 %v882_v51, %s1745_s29  ;;  %v928_v59 = vmul.f32 %v926_v57, %v882_v51  ;;  %s1751_s29 = smov 120  }
 0x2c8   : > { %909 = vrot.lane.b32.xlu0 %v907_v52, %s1746_s20  ;;  %s1753_s20 = smov 32  }
 0x2d0   : > { %930 = vperm.xlu0 %1649, %v883_v53  }
 0x2d8   : > { %1653 = vset.pattern.permute.xlu0 %v1732_v45 }
 0x2d9   : > { %897 = vrot.lane.b32.xlu0 %v895_v54, %s1747_s27  ;;  %s2370_s27 = sld [smem:[#allocation14_spill]] }
 0x2df   : > { %v1014_v37 = vld [vmem:[%s2370_s27 + $0x70] sm:$0xff] }
 0x2e0   : > { %1075 = vmatpush.msra.mxu1 %v1014_v37  ;;  %1030 = vmatpush.msrb.mxu3 %v1014_v37 }
 0x332   : > { %v887_v55 = vpop.permute.xlu0 %886 }
 0x333   : > { %889 = vrot.lane.b32.xlu1 %v887_v55, %s1736_s1 }
 0x33a   : > { %v910_v56 = vpop.permute.xlu0 %909 }
 0x33b   : > { %914 = vperm.xlu1 %1648, %v883_v53  }
 0x342   : > { %v931_v60 = vpop.permute.xlu0 %930 }
 0x343   : > { %v933_v61 = vmul.f32 %v931_v60, %v928_v59  ;;  %941 = vrot.lane.b32.xlu1 %v939_v58, %s1748_s18  ;;  %s2371_s18 = smov %s2370_s27  ;;  %s1758_s27 = smov 15  }
 0x344   : > { %1652 = vset.pattern.permute.xlu1 %v1732_v45  ;;  %v971_v45 = vld [vmem:[%s2333_s17] sm:$0xff]  ;;  %v1015_v38 = vld [vmem:[%s2371_s18 + $0x78] sm:$0xff]  ;;  %v1013_v40 = vld [vmem:[%s2371_s18 + $0x68] sm:$0xff] }
 0x345   : > { %935 = vrot.lane.b32.xlu0 %v933_v61, %s1749_s30  ;;  %v1012_v39 = vld [vmem:[%s2371_s18 + $0x60] sm:$0xff]  ;;  %1095 = vmatpush.msra.mxu2 %v1015_v38  ;;  %v1010_v42 = vld [vmem:[%s2371_s18 + $0x50] sm:$0xff]  ;;  %v1011_v43 = vld [vmem:[%s2371_s18 + $0x58] sm:$0xff]  ;;  %s2372_s30 = smov 1  }
 0x346   : > { %1050 = vmatpush.msra.mxu0 %v1015_v38  ;;  %1076 = vmatpush.msra.mxu1 %v1012_v39  ;;  %v1008_v50 = vld [vmem:[%s2371_s18 + $0x40] sm:$0xff]  ;;  %v1009_v51 = vld [vmem:[%s2371_s18 + $0x48] sm:$0xff]  ;;  %v1007_v54 = vld [vmem:[%s2371_s18 + $0x38] sm:$0xff] }
 0x347   : > { %1096 = vmatpush.msra.mxu2 %v1013_v40  ;;  %1031 = vmatpush.msrb.mxu3 %v1012_v39  ;;  %v1004_v57 = vld [vmem:[%s2371_s18 + $0x20] sm:$0xff]  ;;  %v1005_v58 = vld [vmem:[%s2371_s18 + $0x28] sm:$0xff]  ;;  %v1002_v61 = vld [vmem:[%s2371_s18 + $0x10] sm:$0xff] }
 0x348   : > { %1051 = vmatpush.msra.mxu0 %v1013_v40  ;;  %1077 = vmatpush.msra.mxu1 %v1010_v42 }
 0x349   : > { %1097 = vmatpush.msra.mxu2 %v1011_v43  ;;  %1032 = vmatpush.msrb.mxu3 %v1010_v42 }
 0x34a   : > { %1052 = vmatpush.msra.mxu0 %v1011_v43  ;;  %1078 = vmatpush.msra.mxu1 %v1008_v50 }
 0x34b   : > { %957 = vrot.lane.b32.xlu1 %v955_v62, %s1750_s2  ;;  %v898_v16 = vpop.permute.xlu0 %897  ;;  %1098 = vmatpush.msra.mxu2 %v1009_v51  ;;  %v1003_v62 = vld [vmem:[%s2371_s18 + $0x18] sm:$0xff] }
 0x34c   : > { %1033 = vmatpush.msrb.mxu3 %v1008_v50  ;;  %1053 = vmatpush.msra.mxu0 %v1009_v51 }
 0x34d   : > { %974 = vperm.xlu0 %1653, %v971_v45   ;;  %1099 = vmatpush.msra.mxu2 %v1007_v54  ;;  %v1001_v45 = vld [vmem:[%s2371_s18 + $0x8] sm:$0xff] }
 0x34e   : > { %1054 = vmatpush.msra.mxu0 %v1007_v54 }
 0x34f   : > { %1100 = vmatpush.msra.mxu2 %v1005_v58 }
 0x350   : > { %1055 = vmatpush.msra.mxu0 %v1005_v58 }
 0x351   : > { %1101 = vmatpush.msra.mxu2 %v1003_v62 }
 0x352   : > { %1056 = vmatpush.msra.mxu0 %v1003_v62 }
 0x353   : > { %903 = vperm.xlu1 %1652, %v883_v53   ;;  %1102 = vmatpush.msra.mxu2 %v1001_v45 }
 0x354   : > { %1057 = vmatpush.msra.mxu0 %v1001_v45 }
 0x355   : > { %1558 = vmatpush.msk.msrb.mxu2 %vm587_vm0, %v1986_v29 }
 0x3a5   : > { %v890_v63 = vpop.permute.xlu1 %889 }
 0x3a6   : > { %v891_v0 = vsel %vm797_vm2, %v890_v63, %v887_v55 }
 0x3a7   : > { %892 = vrot.lane.b32.xlu2 %v891_v0, %s1736_s1  ;;  %s1752_s1 = smov 40   ;;  %v1000_v0 = vld [vmem:[%s2371_s18] sm:$0xff] }
 0x3ad   : > { %v915_v1 = vpop.permute.xlu1 %914 }
 0x3af   : > { %946 = vperm.xlu2 %1650, %v883_v53  }
 0x3b5   : > { %v942_v6 = vpop.permute.xlu1 %941 }
 0x3b7   : > { %1651 = vset.pattern.permute.xlu2 %v1740_v12  ;;  %v936_v21 = vpop.permute.xlu0 %935 }
 0x3b8   : > { %962 = vperm.xlu2 %1651, %v883_v53   ;;  %v1006_v53 = vld [vmem:[%s2371_s18 + $0x30] sm:$0xff] }
 0x3b9   : > { %1079 = vmatpush.msra.mxu1 %v1006_v53  ;;  %1034 = vmatpush.msrb.mxu3 %v1006_v53  ;;  %v1271_v53 = vlaneseq }
 0x3bb   : > { %1080 = vmatpush.msra.mxu1 %v1004_v57  ;;  %1035 = vmatpush.msrb.mxu3 %v1004_v57  ;;  %v2226_v54 = vand.u32 127, %v1271_v53  ;;  %v2237_v57 = vld [vmem:[%s2374_s3] sm:$0xff] }
 0x3bd   : > { %v958_v10 = vpop.permute.xlu1 %957  ;;  %1081 = vmatpush.msra.mxu1 %v1002_v61  ;;  %1036 = vmatpush.msrb.mxu3 %v1002_v61  ;;  %vm1291_vm8 = vcmp.lt.s32.totalorder %v2226_v54, 16  ;;  %vm1273_vm9 = vcmp.lt.s32.totalorder %v2226_v54, 17  ;;  %vm1310_vm10 = vcmp.lt.s32.totalorder %v2226_v54, 15  ;;  %vm1329_vm11 = vcmp.lt.s32.totalorder %v2226_v54, 1 }
 0x3be   : > { %vm1360_vm12 = vcmp.lt.s32.totalorder %v2226_v54, 127  ;;  %vm1379_vm13 = vcmp.lt.s32.totalorder %v2226_v54, 113  ;;  %vm1398_vm14 = vcmp.lt.s32.totalorder %v2226_v54, 112  ;;  %vm1417_vm15 = vcmp.lt.s32.totalorder %v2226_v54, 111 }
 0x3bf   : > { %v975_v27 = vpop.permute.xlu0 %974  ;;  %1082 = vmatpush.msra.mxu1 %v1000_v0  ;;  %1037 = vmatpush.msrb.mxu3 %v1000_v0  ;;  %v1276_v0 = vperm.slane %v2237_v57, 0 }
 0x3c1   : > { %1556 = vmatpush.msk.msrb.mxu1 %vm587_vm0, %v1984_v28 }
 0x3c5   : > { %v904_v18 = vpop.permute.xlu1 %903 }
 0x401   : > { %v893_v2 = vpop.permute.xlu2 %892 }
 0x402   : > { %v894_v3 = vsel %vm797_vm2, %v893_v2, %v887_v55  ;;  %v1248_v2 = vld [vmem:[%s2324_s8] sm:$0xf] }
 0x403   : > { %v912_v4 = vmul.f32 %v910_v56, %v894_v3  ;;  %v944_v7 = vmul.f32 %v942_v6, %v894_v3  ;;  %v960_v11 = vmul.f32 %v958_v10, %v894_v3  ;;  %v900_v17 = vmul.f32 %v898_v16, %v894_v3  ;;  %v2145_v3 = vld [vmem:[%s2325_s9] sm:$0xf] }
 0x405   : > { %v917_v5 = vmul.f32 %v915_v1, %v912_v4  ;;  %v906_v20 = vmul.f32 %v904_v18, %v900_v17  ;;  %v1110_v4 = vld.sshfl [vmem:[#allocation1] sm:$0xff pattern:$0x75316420] }
 0x406   : > { %1552 = vmatpush.msk.msra.mxu3 %vm587_vm0, %v1110_v4 }
 0x407   : > { %919 = vrot.lane.b32.xlu2 %v917_v5, %s1751_s29  ;;  %v1111_v5 = vld.sshfl [vmem:[#allocation1 + $0x8] sm:$0xff pattern:$0x75316420] }
 0x408   : > { %1554 = vmatpush.msk.msrb.mxu0 %vm587_vm0, %v1111_v5 }
 0x409   : > { %v947_v8 = vpop.permute.xlu2 %946 }
 0x40a   : > { %v949_v9 = vmul.f32 %v947_v8, %v944_v7 }
 0x40c   : > { %951 = vrot.lane.b32.xlu1 %v949_v9, %s1752_s1  ;;  %s566_s1 = sand.u32 1, %s1722_s28  }
 0x412   : > { %v963_v14 = vpop.permute.xlu2 %962 }
 0x413   : > { %v965_v15 = vmul.f32 %v963_v14, %v960_v11 }
 0x415   : > { %967 = vrot.lane.b32.xlu2 %v965_v15, %s1753_s20  ;;  %s1538_s20 = sshll.u32 %s566_s1, 4 }
 0x416   : > { %s2185_s24 = scalar_lea.vmem [#allocation2], %s1538_s20 }
 0x417   : > { %s1472_s0 = sshll.u32 %s2185_s24, 4  ;;  %s1473_s0 = int_to_ptr.vmem [resolvable:$true] %s1472_s0 }
 0x461   : > { %v920_v19 = vpop.permute.xlu2 %919 }
 0x462   : > { %v922_v22 = vadd.f32 %v920_v19, %v906_v20 }
 0x464   : > { %v938_v23 = vadd.f32 %v936_v21, %v922_v22 }
 0x46f   : > { %v968_v26 = vpop.permute.xlu2 %967 }
 0x47e   : > { %v952_v24 = vpop.permute.xlu1 %951 }
 0x47f   : > { %v954_v25 = vadd.f32 %v952_v24, %v938_v23  ;;  %v1755_v23 = vmov 5  }
 0x481   : > { %v970_v30 = vadd.f32 %v968_v26, %v954_v25 }
 0x483   : > { %v977_v31 = vadd.f32 %v975_v27, %v970_v30 }
 0x485   : > { %v1547_v32 = vmul.f32 -1.442695, %v977_v31 }
 0x487   : > { %1664 = vpow2.f32 %v1547_v32  ;;  %v1757_v32 = vmov 6  }
 0x48d   : > { %v1665_v33 = vpop.eup %1664 }
 0x48e   : > { %v981_v34 = vadd.f32 1.0, %v1665_v33  ;;  %v1759_v33 = vmov 7  }
 0x490   : > { %1666 = vrcp.f32 %v981_v34  ;;  %v993_v44 = vand.u32 2147483648, %v981_v34  ;;  %v991_v49 = vand.u32 2147483647, %v981_v34  ;;  %vm987_vm4 = vweird.f32 %v981_v34 }
 0x492   : > { %v994_v55 = vor.u32 1.1754944e-38, %v993_v44  ;;  %vm992_vm6 = vcmp.eq.f32.partialorder %v991_v49, 8.507059e+37 }
 0x496   : > { %v1667_v35 = vpop.eup %1666 }
 0x497   : > { %v983_v36 = vmul.f32 %v1667_v35, %v981_v34  ;;  %vm988_vm3 = vweird.f32 %v1667_v35  ;;  %v1760_v34 = vmov 8  }
 0x498   : > { %vm989_vm5 = vmor %vm987_vm4, %vm988_vm3  ;;  %1661 = vset.pattern.permute.xlu2 %v1760_v34 }
 0x499   : > { %v984_v41 = vsub.f32 1.0, %v983_v36 }
 0x49b   : > { %v985_v48 = vmul.f32 %v1667_v35, %v984_v41 }
 0x49d   : > { %v986_v52 = vadd.f32 %v1667_v35, %v985_v48 }
 0x49f   : > { %v990_v56 = vsel %vm989_vm5, %v1667_v35, %v986_v52  ;;  %v1432_v35 = vld [vmem:[%s2326_s10] sm:$0xf] }
 0x4a0   : > { %v995_v59 = vsel %vm992_vm6, %v994_v55, %v990_v56  ;;  %v2231_v56 = vld [vmem:[%s2374_s3 + $0x8] sm:$0xff] }
 0x4a1   : > { %v997_v60 = vpack.c.bf16 %v995_v59, %v995_v59  ;;  %v1345_v61 = vperm.slane %v2231_v56, 4  ;;  %v1295_v62 = vperm.slane %v2231_v56, 1  ;;  %v1277_v45 = vperm.slane %v2231_v56, 0 }
 0x4a2   : > { %v1314_v5 = vperm.slane %v2231_v56, 2 }
 0x4a3   : > { %v998_v63 = vunpack.c.l.bf16 %v997_v60 }
 0x4a5   : > { %1063 = vrot.lane.b32.xlu2 %v998_v63, %s1754_s23  ;;  %v999_v1 = vsub.f32 %v995_v59, %v998_v63  ;;  %v1294_v59 = vperm.slane %v2237_v57, 1 }
 0x4a7   : > { %1017 = vrot.lane.b32.xlu1 %v999_v1, %s1754_s23  ;;  %s1756_s23 = smov 17  }
 0x4af   : > { %1251 = vperm.xlu1 %1652, %v1248_v2   ;;  %v1313_v2 = vperm.slane %v2237_v57, 2 }
 0x4b7   : > { %1282 = vperm.xlu1 %1652, %v2145_v3  }
 0x4bf   : > { %1654 = vset.pattern.permute.xlu1 %v1733_v46 }
 0x4c0   : > { %1299 = vperm.xlu1 %1654, %v2145_v3  }
 0x4c8   : > { %1655 = vset.pattern.permute.xlu1 %v1734_v47  ;;  %v1107_v47 = vld [vmem:[%s2322_s6] sm:$0xf] }
 0x4c9   : > { %1318 = vperm.xlu1 %1655, %v2145_v3  }
 0x4d1   : > { %1656 = vset.pattern.permute.xlu1 %v1741_v13  ;;  %v1108_v13 = vld [vmem:[%s2323_s7] sm:$0xf] }
 0x4d2   : > { %1337 = vperm.xlu1 %1656, %v2145_v3  }
 0x4da   : > { %1657 = vset.pattern.permute.xlu1 %v1740_v12 }
 0x4db   : > { %1349 = vperm.xlu1 %1657, %v2145_v3  }
 0x4e3   : > { %1658 = vset.pattern.permute.xlu1 %v1755_v23 }
 0x4e4   : > { %1368 = vperm.xlu1 %1658, %v2145_v3  }
 0x4ec   : > { %1659 = vset.pattern.permute.xlu1 %v1757_v32  ;;  %v1364_v32 = vperm.slane %v2231_v56, 5 }
 0x4ed   : > { %1387 = vperm.xlu1 %1659, %v2145_v3  }
 0x4f5   : > { %1660 = vset.pattern.permute.xlu1 %v1759_v33 }
 0x4f6   : > { %1406 = vperm.xlu1 %1660, %v2145_v3  }
 0x4ff   : > { %v1064_v46 = vpop.permute.xlu2 %1063 }
 0x500   : > { %1550 = vmatmul.msk.f32.vlgmr.msra.gmra.mxu1 %vm1019_vm7, %v1064_v46  ;;  %1551 = vmatmul.msk.f32.vlgmr.msra.gmra.mxu2 %vm1019_vm7, %v1064_v46  ;;  %v1344_v46 = vperm.slane %v2237_v57, 4 }
 0x508   : > { %1559 = vmatmul.msk.f32.vlgmr.msrb.gmra.mxu2 %vm714_vm1, %v1107_v47  ;;  %1557 = vmatmul.msk.f32.vlgmr.msrb.gmra.mxu1 %vm714_vm1, %v1107_v47 }
 0x519   : > { %v1018_v12 = vpop.permute.xlu1 %1017 }
 0x51a   : > { %1548 = vmatmul.msk.f32.vlgmr.msrb.gmra.mxu3 %vm1019_vm7, %v1018_v12  ;;  %1549 = vmatmul.msk.f32.vlgmr.msra.gmra.mxu0 %vm1019_vm7, %v1018_v12 }
 0x51b   : > { %1560 = vmatpush.msk.msrb.mxu3 %vm587_vm0, %v1984_v28  ;;  %1562 = vmatpush.msk.msra.mxu0 %vm587_vm0, %v1986_v29 }
 0x521   : > { %v1252_v17 = vpop.permute.xlu1 %1251 }
 0x522   : > { %1553 = vmatmul.msk.f32.vlgmr.msra.gmra.mxu3 %vm714_vm1, %v1107_v47  ;;  %1555 = vmatmul.msk.f32.vlgmr.msrb.gmra.mxu0 %vm714_vm1, %v1107_v47 }
 0x529   : > { %v1283_v37 = vpop.permute.xlu1 %1282 }
 0x52a   : > { %1561 = vmatmul.msk.f32.vlgmr.msrb.gmra.mxu3 %vm714_vm1, %v1108_v13  ;;  %1563 = vmatmul.msk.f32.vlgmr.msra.gmra.mxu0 %vm714_vm1, %v1108_v13 }
 0x532   : > { %v1300_v39 = vpop.permute.xlu1 %1299 }
 0x53b   : > { %v1319_v42 = vpop.permute.xlu1 %1318 }
 0x544   : > { %v2222_v48 = vpop.permute.xlu1 %1337 }
 0x54d   : > { %v2224_v52 = vpop.permute.xlu1 %1349 }
 0x556   : > { %v2241_v60 = vpop.permute.xlu1 %1368 }
 0x55f   : > { %v1388_v33 = vpop.permute.xlu1 %1387 }
 0x57d   : > { %v1084_v8 = vpop.f32.mrf.mxu1 }
 0x583   : > { %v1104_v7 = vpop.f32.mrf.mxu2 }
 0x585   : > { %v1180_v15 = vpop.f32.mrf.mxu1 }
 0x58b   : > { %v1200_v29 = vpop.f32.mrf.mxu2 }
 0x597   : > { %v1059_v6 = vpop.f32.mrf.mxu0 }
 0x598   : > { %v2177_v20 = vadd.f32 %v1104_v7, %v1059_v6  ;;  %v1332_v7 = vperm.slane %v2237_v57, 3 }
 0x59d   : > { %v1039_v28 = vpop.f32.mrf.mxu3 }
 0x59e   : > { %v2188_v27 = vadd.f32 %v1084_v8, %v1039_v28  ;;  %v1333_v28 = vperm.slane %v2231_v56, 3 }
 0x59f   : > { %v1156_v9 = vpop.f32.mrf.mxu0 }
 0x5a0   : > { %v1201_v11 = vadd.f32 %v1200_v29, %v1156_v9 }
 0x5a5   : > { %v1136_v10 = vpop.f32.mrf.mxu3 }
 0x5a6   : > { %v1181_v19 = vadd.f32 %v1180_v15, %v1136_v10 }
 0x5a7   : > { %v1243_v14 = vpop.f32.mrf.mxu0 }
 0x5a8   : > { %v1247_v16 = vadd.f32 %v1243_v14, %v1201_v11 }
 0x5aa   : > { %v1255_v18 = vadd.f32 %v1252_v17, %v1247_v16 }
 0x5ac   : > { %v2179_v21 = vmax.f32 %v1255_v18, 0.0 }
 0x5ad   : > { %v1223_v22 = vpop.f32.mrf.mxu3 }
 0x5ae   : > { %v1246_v24 = vadd.f32 %v1223_v22, %v1181_v19  ;;  %1269 = vrot.lane.b32.xlu0 %v2179_v21, %s1756_s23  ;;  %v1259_v25 = vmul.f32 %v2179_v21, %v2177_v20  ;;  %v1347_v18 = vmul.f32 %v1345_v61, %v2179_v21 }
 0x5b0   : > { %v1254_v26 = vadd.f32 %v1252_v17, %v1246_v24  ;;  %1261 = vst [vmem:[%s2185_s24 + $0x8] sm:$0xf] %v1259_v25 }
 0x5b2   : > { %v2190_v30 = vmax.f32 %v1254_v26, 0.0 }
 0x5b4   : > { %1267 = vrot.lane.b32.xlu2 %v2190_v30, %s1756_s23  ;;  %v1258_v31 = vmul.f32 %v2190_v30, %v2188_v27  ;;  %v1346_v17 = vmul.f32 %v1344_v46, %v2190_v30  ;;  %s2375_s23 = sld [smem:[#allocation18_spill]] }
 0x5b6   : > { %1289 = vrot.lane.b32.xlu0 %v2179_v21, %s1750_s2  ;;  %1260 = vst [vmem:[%s2185_s24] sm:$0xf] %v1258_v31  ;;  %v1363_v31 = vperm.slane %v2237_v57, 5 }
 0x5ba   : > { %s1688_s20 = scalar_lea.hbm %s2375_s23, 32 }
 0x5bc   : > { %1287 = vrot.lane.b32.xlu2 %v2190_v30, %s1750_s2  ;;  %s1761_s2 = smov 113  }
 0x5be   : > { %1308 = vrot.lane.b32.xlu0 %v2179_v21, %s1758_s27 }
 0x5c4   : > { %1306 = vrot.lane.b32.xlu2 %v2190_v30, %s1758_s27  ;;  %s1470_s27 = scalar_lea.hbm %s2375_s23, %s1570_s19 }
 0x5c6   : > { %1327 = vrot.lane.b32.xlu0 %v2179_v21, %s2372_s30 }
 0x5cc   : > { %1325 = vrot.lane.b32.xlu2 %v2190_v30, %s2372_s30 }
 0x5ce   : > { %1358 = vrot.lane.b32.xlu0 %v2179_v21, %s2373_s22 }
 0x5d4   : > { %1356 = vrot.lane.b32.xlu2 %v2190_v30, %s2373_s22  ;;  %s1474_s22 = sshll.u32 %s1470_s27, 4  ;;  %s1475_s22 = int_to_ptr.hbm [resolvable:$true] %s1474_s22 }
 0x5d6   : > { %1377 = vrot.lane.b32.xlu0 %v2179_v21, %s1761_s2 }
 0x5dc   : > { %1375 = vrot.lane.b32.xlu2 %v2190_v30, %s1761_s2  ;;  %s1459_s2 = scalar_lea.sflag [#allocation3], %s566_s1 }
 0x5de   : > { %1396 = vrot.lane.b32.xlu0 %v2179_v21, %s1762_s21 }
 0x5e4   : > { %1394 = vrot.lane.b32.xlu2 %v2190_v30, %s1762_s21  ;;  %s1682_s21 = sshra.s32 %s1475_s22, 4  ;;  %s1683_s21 = int_to_ptr.hbm [resolvable:$true] %s1682_s21 }
 0x5e5   : > { %p1689_p0 = scmp.lt.s32.totalorder %s1683_s21, %s2375_s23 }
 0x5e6   : > { %1415 = vrot.lane.b32.xlu0 %v2179_v21, %s1763_s25 }
 0x5ec   : > { %1413 = vrot.lane.b32.xlu2 %v2190_v30, %s1763_s25  ;;  %v1382_v30 = vperm.slane %v2237_v57, 6  ;;  %s1684_s25 = scalar_lea.hbm %s1683_s21, 16 }
 0x5ed   : > { %p1685_p11 = scmp.ne.s32.totalorder %s1683_s21, %s1684_s25  ;;  %p1690_p1 = scmp.lt.s32.totalorder %s1688_s20, %s1684_s25 }
 0x5ee   : > { %1435 = vperm.xlu0 %1653, %v1432_v35  }
 0x5ef   : > { %p1686_p12 = pnand %p1685_p11, %p1897_p5  ;;  %p1691_p2 = por %p1690_p1, %p1689_p0 }
 0x5f1   : > { %p1687_p13 = pneg %p1686_p12 }
 0x5f3   : > { %p1692_p3 = pnand %p1691_p2, %p1687_p13 }
 0x5f4   : > { %1425 = vperm.xlu2 %1661, %v2145_v3  }
 0x60e   : > { %v1268_v36 = vpop.permute.xlu2 %1267 }
 0x616   : > { %v1288_v38 = vpop.permute.xlu2 %1287 }
 0x61e   : > { %v1307_v40 = vpop.permute.xlu2 %1306 }
 0x620   : > { %v1270_v41 = vpop.permute.xlu0 %1269 }
 0x621   : > { %v1274_v3 = vsel %vm1273_vm9, %v1268_v36, %v1270_v41  ;;  %v1275_v4 = vsel %vm1273_vm9, %v1270_v41, %v1268_v36 }
 0x622   : > { %v1278_v8 = vmul.f32 %v1276_v0, %v1275_v4  ;;  %v1279_v9 = vmul.f32 %v1277_v45, %v1274_v3 }
 0x624   : > { %v1285_v25 = vmul.f32 %v1283_v37, %v1278_v8  ;;  %v1286_v26 = vmul.f32 %v1283_v37, %v1279_v9 }
 0x626   : > { %v1326_v44 = vpop.permute.xlu2 %1325 }
 0x628   : > { %v1290_v43 = vpop.permute.xlu0 %1289 }
 0x629   : > { %v1293_v63 = vsel %vm1291_vm8, %v1290_v43, %v1288_v38  ;;  %v1292_v1 = vsel %vm1291_vm8, %v1288_v38, %v1290_v43 }
 0x62a   : > { %v1296_v47 = vmul.f32 %v1294_v59, %v1293_v63  ;;  %v1297_v6 = vmul.f32 %v1295_v62, %v1292_v1 }
 0x62c   : > { %v1302_v19 = vmul.f32 %v1300_v39, %v1296_v47  ;;  %v1303_v22 = vmul.f32 %v1300_v39, %v1297_v6  ;;  %v1383_v39 = vperm.slane %v2231_v56, 6  ;;  %v1662_v6 = vld [vmem:[%s2374_s3 + $0x10] ss:$0 sm:$0xff] }
 0x62e   : > { %v1357_v50 = vpop.permute.xlu2 %1356  ;;  %v1304_v21 = vadd.f32 %v1302_v19, %v1285_v25 }
 0x630   : > { %v1309_v49 = vpop.permute.xlu0 %1308 }
 0x631   : > { %v1311_v12 = vsel %vm1310_vm10, %v1307_v40, %v1309_v49  ;;  %v1312_v13 = vsel %vm1310_vm10, %v1309_v49, %v1307_v40  ;;  %v1305_v40 = vadd.f32 %v1303_v22, %v1286_v26  ;;  %v1402_v49 = vperm.slane %v2231_v56, 7 }
 0x632   : > { %v1315_v14 = vmul.f32 %v1313_v2, %v1312_v13  ;;  %v1316_v15 = vmul.f32 %v1314_v5, %v1311_v12  ;;  %v1352_v2 = vmul.f32 %v2224_v52, %v1346_v17  ;;  %v1407_v5 = vpop.permute.xlu1 %1406 }
 0x634   : > { %v1321_v34 = vmul.f32 %v1319_v42, %v1315_v14  ;;  %v1322_v35 = vmul.f32 %v1319_v42, %v1316_v15  ;;  %v1401_v42 = vperm.slane %v2237_v57, 7 }
 0x636   : > { %v1376_v55 = vpop.permute.xlu2 %1375  ;;  %v1324_v53 = vadd.f32 %v1322_v35, %v1305_v40 }
 0x638   : > { %v1328_v51 = vpop.permute.xlu0 %1327 }
 0x639   : > { %v1330_v29 = vsel %vm1329_vm11, %v1326_v44, %v1328_v51  ;;  %v1331_v10 = vsel %vm1329_vm11, %v1328_v51, %v1326_v44  ;;  %v1323_v51 = vadd.f32 %v1321_v34, %v1304_v21 }
 0x63a   : > { %v1334_v23 = vmul.f32 %v1332_v7, %v1331_v10  ;;  %v1335_v24 = vmul.f32 %v1333_v28, %v1330_v29 }
 0x63c   : > { %v1340_v41 = vmul.f32 %v2222_v48, %v1334_v23  ;;  %v1341_v37 = vmul.f32 %v2222_v48, %v1335_v24 }
 0x63e   : > { %v1395_v11 = vpop.permute.xlu2 %1394  ;;  %v1342_v0 = vadd.f32 %v1340_v41, %v1323_v51  ;;  %v1343_v45 = vadd.f32 %v1341_v37, %v1324_v53 }
 0x640   : > { %v1359_v58 = vpop.permute.xlu0 %1358  ;;  %v1354_v46 = vadd.f32 %v1352_v2, %v1342_v0 }
 0x641   : > { %v1361_v36 = vsel %vm1360_vm12, %v1357_v50, %v1359_v58  ;;  %v1362_v38 = vsel %vm1360_vm12, %v1359_v58, %v1357_v50 }
 0x642   : > { %v1365_v59 = vmul.f32 %v1363_v31, %v1361_v36  ;;  %v1366_v61 = vmul.f32 %v1364_v32, %v1362_v38  ;;  %v1445_v32 = vrot.slane %v2177_v20, 4 }
 0x644   : > { %v1371_v57 = vmul.f32 %v2241_v60, %v1365_v59  ;;  %v1372_v56 = vmul.f32 %v2241_v60, %v1366_v61 }
 0x646   : > { %v1414_v58 = vpop.permute.xlu2 %1413  ;;  %v1373_v7 = vadd.f32 %v1371_v57, %v1354_v46 }
 0x648   : > { %v1378_v16 = vpop.permute.xlu0 %1377 }
 0x649   : > { %v1380_v43 = vsel %vm1379_vm13, %v1376_v55, %v1378_v16  ;;  %v1381_v44 = vsel %vm1379_vm13, %v1378_v16, %v1376_v55  ;;  %v1353_v55 = vmul.f32 %v2224_v52, %v1347_v18  ;;  %v1663_v52 = vld [vmem:[%s2374_s3 + $0x18] ss:$0 sm:$0xff] }
 0x64a   : > { %v1384_v1 = vmul.f32 %v1382_v30, %v1380_v43  ;;  %v1385_v48 = vmul.f32 %v1383_v39, %v1381_v44 }
 0x64b   : > { %v1355_v47 = vadd.f32 %v1353_v55, %v1343_v45 }
 0x64c   : > { %v1390_v12 = vmul.f32 %v1388_v33, %v1384_v1  ;;  %v1391_v13 = vmul.f32 %v1388_v33, %v1385_v48  ;;  %v1444_v33 = vrot.slane %v2188_v27, 4 }
 0x64d   : > { %v1374_v28 = vadd.f32 %v1372_v56, %v1355_v47 }
 0x64e   : > { %v1426_v10 = vpop.permute.xlu2 %1425 }
 0x64f   : > { %v1393_v14 = vadd.f32 %v1391_v13, %v1374_v28 }
 0x650   : > { %v1397_v50 = vpop.permute.xlu0 %1396 }
 0x651   : > { %v1399_v62 = vsel %vm1398_vm14, %v1395_v11, %v1397_v50  ;;  %v1400_v63 = vsel %vm1398_vm14, %v1397_v50, %v1395_v11  ;;  %v1392_v11 = vadd.f32 %v1390_v12, %v1373_v7 }
 0x652   : > { %v1403_v3 = vmul.f32 %v1401_v42, %v1399_v62  ;;  %v1404_v4 = vmul.f32 %v1402_v49, %v1400_v63 }
 0x654   : > { %v1409_v60 = vmul.f32 %v1407_v5, %v1403_v3  ;;  %v1410_v8 = vmul.f32 %v1407_v5, %v1404_v4 }
 0x656   : > { %v1411_v17 = vadd.f32 %v1409_v60, %v1392_v11  ;;  %v1412_v18 = vadd.f32 %v1410_v8, %v1393_v14 }
 0x658   : > { %v1416_v9 = vpop.permute.xlu0 %1415 }
 0x659   : > { %v1418_v29 = vsel %vm1417_vm15, %v1414_v58, %v1416_v9  ;;  %v1419_v54 = vsel %vm1417_vm15, %v1416_v9, %v1414_v58 }
 0x65a   : > { %v1422_v15 = vmul.f32 %v1662_v6, %v1418_v29  ;;  %v1423_v16 = vmul.f32 %v1663_v52, %v1419_v54 }
 0x65c   : > { %v1428_v19 = vmul.f32 %v1426_v10, %v1422_v15  ;;  %v1429_v22 = vmul.f32 %v1426_v10, %v1423_v16 }
 0x65e   : > { %v1430_v23 = vadd.f32 %v1428_v19, %v1411_v17  ;;  %v1431_v24 = vadd.f32 %v1429_v22, %v1412_v18 }
 0x660   : > { %v1436_v25 = vpop.permute.xlu0 %1435 }
 0x661   : > { %v1438_v26 = vadd.f32 %v1436_v25, %v1430_v23  ;;  %v1439_v31 = vadd.f32 %v1436_v25, %v1431_v24 }
 0x663   : > { %v1440_v34 = vmax.f32 %v1438_v26, 0.0  ;;  %v1441_v35 = vmax.f32 %v1439_v31, 0.0 }
 0x665   : > { %v1448_v30 = vmul.f32 %v1444_v33, %v1440_v34  ;;  %v1449_v21 = vmul.f32 %v1445_v32, %v1441_v35 }
 0x667   : > { %v1452_v36 = vrot.slane %v1448_v30, 4  ;;  %v1453_v38 = vrot.slane %v1449_v21, 4 }
 0x669   : > { %1456 = vst [vmem:[%s2185_s24] sm:$0xf0] %v1452_v36 }
 0x66a   : > { %1457 = vst [vmem:[%s2185_s24 + $0x8] sm:$0xf0] %v1453_v38 }
 0x66b   : > { %1695 = shalt.err (!%p1692_p3)
}
 0x66c   : > { %1571 = dma.vmem_to_hbm [thread:$0]  (%p1897_p5), %s1473_s0, 256, %s1475_s22, %s1459_s2  }
 0x66d PF: > { %s2377_s1 = sld [smem:[#allocation7_spill]] }
 0x66e   : > { %s2378_s24 = sld [smem:[#allocation5_spill]] }
 0x673   : > { %p1577_p4 = scmp.ge.s32.totalorder %s2377_s1, 2 }
 0x674   : > { %s1486_s5 = sand.u32 1, %s2378_s24  }
 0x675   : > { %p1574_p7 = pnand %p1577_p4, %p1901_p6  ;;  %s1487_s19 = scalar_lea.sflag [#allocation3], %s1486_s5 }
 0x677   : > { %p1575_p8 = pneg %p1574_p7 }
 0x679   : > { %1713 = dma.done.wait (%p1575_p8), %s1487_s19, 256  }
 0x67a   : > { %1715 = vsyncadd (%p1575_p8), %s1487_s19, 4294967040  ;;  %s2380_s30 = sld [smem:[#allocation8_spill]]  ;;  %s2383_s27 = smov %s1722_s28 }
 0x67b   : > { %s2381_s3 = sld [smem:[#allocation6_spill]] }
 0x67c   : > { %s2382_s29 = sld [smem:[#allocation9_spill]] }
 0x680   : > { %p28_p9 = scmp.ge.s32.totalorder %s2380_s30, 4  }
 0x681   : > { %s2384_s28 = smov %s2381_s3 }
 0x682   :  { %30 = sbr.rel (!%p28_p9) target bundleno = 11 (0xb), region = 127 }
 0x687   :  { %1493 = vsyncpa [#allocation3], 1 }
 0x688   :  { %1495 = vsyncpa [#allocation3 + $0x1], 1 }

</bundles_post_ra>
